<compile_context>
chip_gen: v7x
topology: tpu7x:2x2x1
jax: 0.10.0
libtpu: 0.0.40
codegen_flags: <defaults>
</compile_context>

<pallas_src>
import functools
import math

import jax
import jax.numpy as jnp
from jax import lax
from jax.experimental import pallas as pl
from jax.experimental.pallas import tpu as pltpu


_SUBLANE = 8               # f32 sublane tile
_LANE = 128                # lane tile
_MAX_B_CHUNK = 128         # cap on per-grid-step batch rows (MXU M dim)
_VMEM_BUDGET = 48 << 20    # conservative working-set budget (v7x has 64 MiB VMEM)


def _round_up(x, m):
    return (x + m - 1) // m * m


def _pick_batch_chunk(batch, seq_len, hidden_pad):
    """Largest sublane-aligned batch chunk that fits the VMEM budget and the batch."""
    three_hp = 3 * hidden_pad
    # Per batch-row VMEM bytes (gates + state blocks are double-buffered by Pallas).
    per_row = 2 * seq_len * (three_hp + hidden_pad) * 4 + 2 * hidden_pad * 4
    fixed = 2 * (hidden_pad * three_hp * 2 + hidden_pad * 4)     # weights + n-bias
    bc_max = (_VMEM_BUDGET - fixed) // max(per_row, 1)
    bc_max = max(_SUBLANE, min(_MAX_B_CHUNK, (bc_max // _SUBLANE) * _SUBLANE))
    num_chunks = max(1, -(-batch // bc_max))                      # ceil
    bc = _round_up(max(1, -(-batch // num_chunks)), _SUBLANE)     # even split
    return int(min(bc, bc_max))


def _gru_recurrent_kernel(gates_ref, h0_ref, whh_ref, bhn_ref, state_ref, *,
                          hidden_pad, unroll):
    """Recurrent part of the GRU for one batch chunk; time loop inside the kernel.

    gates_ref : (L, Bc, 3*Hp) f32  x @ W_ih + (b_ih + [b_hr, b_hz, 0]) (+1e9 on z
                                   where padded); gate order [r | z | n]
    h0_ref    : (Bc, Hp)      f32  initial hidden state
    whh_ref   : (Hp, 3*Hp)    bf16 fused hidden weights [r | z | n]
    bhn_ref   : (1, Hp)       f32  hidden bias of the n gate (kept separate: r * (...))
    state_ref : (L, Bc, Hp)   f32  per-step hidden state (output)
    """
    hp = hidden_pad
    whh = whh_ref[...]                      # load constants once per grid step
    bhn = bhn_ref[...]
    h0 = h0_ref[...]
    seq_len = gates_ref.shape[0]

    def step(t, h_prev):
        g = gates_ref[t]                    # (Bc, 3Hp) f32, lane-dense
        # Single fused recurrent matmul on the critical path (bf16 in, f32 acc).
        hh = jnp.dot(h_prev.astype(jnp.bfloat16), whh,
                     preferred_element_type=jnp.float32)          # (Bc, 3Hp)
        r = jax.nn.sigmoid(g[:, :hp] + hh[:, :hp])
        z = jax.nn.sigmoid(g[:, hp:2 * hp] + hh[:, hp:2 * hp])    # == 1.0 on padded steps
        n = jnp.tanh(g[:, 2 * hp:] + r * (hh[:, 2 * hp:] + bhn))
        h_new = (1.0 - z) * n + z * h_prev                        # PyTorch GRU update
        state_ref[t] = h_new.astype(state_ref.dtype)
        return h_new

    lax.fori_loop(0, seq_len, step, h0, unroll=unroll)


def _gru_recurrent(gates_tm, h0, whh_fused, b_hn, b_chunk):
    """gates_tm: [L, Bp, 3*Hp] f32 (time-major), h0: [Bp, Hp]."""
    L, Bp, three_hp = gates_tm.shape
    Hp = three_hp // 3
    num_chunks = Bp // b_chunk

    # Explicit VMEM budget (double-buffered input/output blocks + constants).
    block_bytes = (2 * L * b_chunk * three_hp * 4       # gates blocks
                   + 2 * b_chunk * Hp * 4               # h0 blocks
                   + 2 * Hp * three_hp * 2              # W_hh (bf16)
                   + 2 * Hp * 4                         # b_hn
                   + 2 * L * b_chunk * Hp * 4)          # state output blocks
    vmem_limit = int(min(max(block_bytes + (2 << 20), 16 << 20), 64 << 20))

    grid_spec = pltpu.PrefetchScalarGridSpec(
        num_scalar_prefetch=0,
        grid=(num_chunks,),                                          # batch chunks only
        in_specs=[
            pl.BlockSpec((L, b_chunk, three_hp), lambda b: (0, b, 0)),  # gates
            pl.BlockSpec((b_chunk, Hp), lambda b: (b, 0)),              # h0
            pl.BlockSpec((Hp, three_hp), lambda b: (0, 0)),             # W_hh fused (bf16)
            pl.BlockSpec((1, Hp), lambda b: (0, 0)),                    # b_hn
        ],
        out_specs=pl.BlockSpec((L, b_chunk, Hp), lambda b: (0, b, 0)),  # state (lane-dense)
    )

    kernel = functools.partial(
        _gru_recurrent_kernel,
        hidden_pad=Hp,
        unroll=(True if L <= 32 else 8),
    )
    return pl.pallas_call(
        kernel,
        out_shape=jax.ShapeDtypeStruct((L, Bp, Hp), jnp.float32),
        grid_spec=grid_spec,
        compiler_params=pltpu.CompilerParams(
            dimension_semantics=("parallel",),   # batch chunks are independent (megacore)
            vmem_limit_bytes=vmem_limit,
        ),
    )(gates_tm, h0, whh_fused, b_hn)


def _gru_forward_impl(x, hidden_state, padding_mask, w_ih_fused, bias_x,
                      w_hh_fused, b_hn):
    """x: [B, L, D_in] f32, hidden_state: [B, H] f32, padding_mask: [B, L] bool.

    Returns the padded per-step states [B, L, Hp] (caller slices to H / seq_q_len).
    """
    B, L, d_in = x.shape
    H = hidden_state.shape[-1]
    Hp = b_hn.shape[-1]
    three_hp = 3 * Hp

    # Hoisted input projection: one large matmul over all B*L rows (bf16 -> f32).
    gates = jnp.dot(x.reshape(B * L, d_in).astype(jnp.bfloat16), w_ih_fused,
                    preferred_element_type=jnp.float32)
    gates = gates.reshape(B, L, three_hp) + bias_x

    # Fold the padding mask into the update gate: z -> 1.0 exactly on padded steps,
    # so h_t == h_{t-1} bit-exactly and the kernel needs no mask input.
    pad_bias = padding_mask.astype(jnp.float32)[..., None] * jnp.float32(1e9)
    gates = gates.at[..., Hp:2 * Hp].add(pad_bias)

    # Adaptive batch chunk, pad batch to a multiple of it, go time-major.
    bc = _pick_batch_chunk(B, L, Hp)
    Bp = _round_up(max(B, bc), bc)
    pad_b = Bp - B
    gates_tm = jnp.transpose(jnp.pad(gates, ((0, pad_b), (0, 0), (0, 0))), (1, 0, 2))
    h0 = jnp.pad(hidden_state.astype(jnp.float32), ((0, pad_b), (0, Hp - H)))

    state_tm = _gru_recurrent(gates_tm, h0, w_hh_fused, b_hn, bc)
    return jnp.transpose(state_tm, (1, 0, 2))[:B]        # [B, L, Hp]


_gru_forward = jax.jit(_gru_forward_impl)


class ModelBaseAttentionRepPallas:
    """JAX/Pallas port of ModelBaseAttentionRep (canonical recurrent representation)."""

    def __init__(self, obs_names, obs_shapes, d_action_sizes, c_action_size,
                 is_target=False, model_abs_dir=None, use_dilation=False,
                 hidden_size=32, seed=0):
        self.obs_names = obs_names
        self.obs_shapes = obs_shapes
        self.d_action_sizes = d_action_sizes
        self.c_action_size = c_action_size
        self.is_target = is_target
        self.model_abs_dir = model_abs_dir
        self.use_dilation = use_dilation
        self._offline_action_index = -1
        try:
            self._offline_action_index = self.obs_names.index('_OFFLINE_ACTION')
        except ValueError:
            pass

        self.action_size = sum(d_action_sizes) + c_action_size
        obs_dim = sum(int(math.prod(s)) for s in obs_shapes)
        self.input_size = obs_dim + self.action_size
        self.hidden_size = hidden_size
        self.hidden_pad = _round_up(hidden_size, _LANE)   # lane tile

        # Deterministic parameter init (synthetic weights, not a checkpoint).
        key = jax.random.PRNGKey(seed)
        k1, k2, k3, k4 = jax.random.split(key, 4)
        scale = 1.0 / jnp.sqrt(jnp.float32(hidden_size))
        # Raw per-gate params (gate order [r, z, n]); kept f32 for the reference check.
        self.w_ih = (jax.random.uniform(k1, (3, self.input_size, hidden_size),
                                        jnp.float32, -1.0, 1.0) * scale)
        self.w_hh = (jax.random.uniform(k2, (3, hidden_size, hidden_size),
                                        jnp.float32, -1.0, 1.0) * scale)
        self.b_ih = (jax.random.uniform(k3, (3, 1, hidden_size),
                                        jnp.float32, -1.0, 1.0) * scale)
        self.b_hh = (jax.random.uniform(k4, (3, 1, hidden_size),
                                        jnp.float32, -1.0, 1.0) * scale)

        # ---- fused / padded / bf16 parameters used by the kernel ----
        H, Hp = hidden_size, self.hidden_pad

        def pad_cols(w):   # pad trailing dim H -> Hp with zeros
            return jnp.pad(w, [(0, 0)] * (w.ndim - 1) + [(0, Hp - H)])

        # W_ih fused: (D_in, 3*Hp), gate order [r | z | n]
        self.w_ih_fused = jnp.concatenate(
            [pad_cols(self.w_ih[g]) for g in range(3)], axis=-1).astype(jnp.bfloat16)
        # W_hh fused: (Hp, 3*Hp) (rows padded with zeros too)
        self.w_hh_fused = jnp.concatenate(
            [jnp.pad(self.w_hh[g], ((0, Hp - H), (0, Hp - H))) for g in range(3)],
            axis=-1).astype(jnp.bfloat16)
        # Input-side bias with the r/z hidden biases folded in: (1, 3*Hp)
        self.bias_x = jnp.concatenate([
            pad_cols(self.b_ih[0] + self.b_hh[0]),
            pad_cols(self.b_ih[1] + self.b_hh[1]),
            pad_cols(self.b_ih[2]),
        ], axis=-1)
        # Hidden-side bias of the n gate: (1, Hp)
        self.b_hn = pad_cols(self.b_hh[2])

    def forward(self, index, obs_list, pre_action=None, seq_q_len=1,
                hidden_state=None, is_prev_hidden_state=False,
                query_only_attend_to_rest_key=False, padding_mask=None):
        """
        index:        [batch, L] positional indices (unused here, see TODO above)
        obs_list:     list of [batch, L, *obs_shape_i]
        pre_action:   [batch, L, action_size] or None
        hidden_state: [batch, hidden_size] or None (used as the initial carry)
        padding_mask: bool [batch, L] or None (True == padded)
        returns: state [batch, seq_q_len, hidden_size], hidden_state_out [batch, hidden_size]
        """
        del index, is_prev_hidden_state, query_only_attend_to_rest_key

        B, L = obs_list[0].shape[:2]
        H = self.hidden_size

        flat_obs = [o.reshape(B, L, -1).astype(jnp.float32) for o in obs_list]
        if pre_action is None:
            pre_action = jnp.zeros((B, L, self.action_size), jnp.float32)
        x = jnp.concatenate(flat_obs + [pre_action.astype(jnp.float32)], axis=-1)
        if hidden_state is None:
            hidden_state = jnp.zeros((B, H), jnp.float32)
        if padding_mask is None:
            padding_mask = jnp.zeros((B, L), jnp.bool_)

        state_padded = _gru_forward(x, hidden_state.astype(jnp.float32),
                                    padding_mask, self.w_ih_fused, self.bias_x,
                                    self.w_hh_fused, self.b_hn)
        state = state_padded[:, :, :H]          # [B, L, H]
        hidden_out = state[:, -1, :]            # == h_L (padded steps hold prev state)
        return state[:, -seq_q_len:, :], hidden_out

    __call__ = forward


def _reference_gru(x_tm, h0, w_ih, w_hh, b_ih, b_hh, mask_tm):
    """Pure-JAX per-gate reference with the same matmul precision (bf16 in, f32 acc)."""
    def step(h, inp):
        x_t, m_t = inp
        xb = x_t.astype(jnp.bfloat16)
        hb = h.astype(jnp.bfloat16)
        i = [jnp.dot(xb, w_ih[g].astype(jnp.bfloat16),
                     preferred_element_type=jnp.float32) + b_ih[g] for g in range(3)]
        g = [jnp.dot(hb, w_hh[k].astype(jnp.bfloat16),
                     preferred_element_type=jnp.float32) + b_hh[k] for k in range(3)]
        r = jax.nn.sigmoid(i[0] + g[0])
        z = jax.nn.sigmoid(i[1] + g[1])
        n = jnp.tanh(i[2] + r * g[2])
        h_new = (1.0 - z) * n + z * h
        h_new = jnp.where(m_t > 0.0, h, h_new)
        return h_new, h_new

    h_last, states = jax.lax.scan(step, h0, (x_tm, mask_tm))
    return states, h_last


if __name__ == "__main__":
    key = jax.random.PRNGKey(0)

    batch, L = 2, 8
    obs_names = ['vector_obs']
    obs_shapes = [(6,)]
    d_action_sizes = [3, 2]
    c_action_size = 2
    hidden = 32

    model = ModelBaseAttentionRepPallas(obs_names, obs_shapes, d_action_sizes,
                                        c_action_size, is_target=False,
                                        hidden_size=hidden, seed=0)

    k1, k2, k3 = jax.random.split(key, 3)
    obs = jax.random.normal(k1, (batch, L, 6), jnp.float32)
    pre_action = jax.random.normal(k2, (batch, L, model.action_size), jnp.float32)
    hidden_state = jax.random.normal(k3, (batch, hidden), jnp.float32)
    padding_mask = jnp.zeros((batch, L), jnp.bool_).at[:, -2:].set(True)
    index = jnp.broadcast_to(jnp.arange(L)[None, :], (batch, L))

    state, h_n = model(index, [obs], pre_action=pre_action, seq_q_len=L,
                       hidden_state=hidden_state, is_prev_hidden_state=True,
                       padding_mask=padding_mask)
    state = jax.block_until_ready(state)
    h_n = jax.block_until_ready(h_n)

    # Cross-check against a pure-JAX reference.
    x = jnp.concatenate([obs.reshape(batch, L, -1), pre_action], axis=-1)
    x_tm = jnp.transpose(x, (1, 0, 2))
    mask_tm = jnp.transpose(padding_mask.astype(jnp.float32), (1, 0))[:, :, None]
    ref_states_tm, ref_hn = _reference_gru(x_tm, hidden_state, model.w_ih, model.w_hh,
                                           model.b_ih, model.b_hh, mask_tm)
    ref_state = jnp.transpose(ref_states_tm, (1, 0, 2))

    assert state.shape == (batch, L, hidden)
    assert h_n.shape == (batch, hidden)
    assert jnp.allclose(state, ref_state, atol=1e-3, rtol=1e-3), \
        float(jnp.max(jnp.abs(state - ref_state)))
    assert jnp.allclose(h_n, ref_hn, atol=1e-3, rtol=1e-3)

    print("KERNEL_OK")
</pallas_src>

<mosaic_0001>
module attributes {stable_mosaic.version = 11 : i64} {
  func.func @_gru_recurrent_kernel(%arg0: i32, %arg1: memref<8x8x384xf32, #tpu.memory_space<vmem>>, %arg2: memref<8x128xf32, #tpu.memory_space<vmem>>, %arg3: memref<128x384xbf16, #tpu.memory_space<vmem>>, %arg4: memref<1x128xf32, #tpu.memory_space<vmem>>, %arg5: memref<8x8x128xf32, #tpu.memory_space<vmem>>) attributes {dimension_semantics = [#tpu.dimension_semantics<parallel>], iteration_bounds = array<i64: 1>, scalar_prefetch = 0 : i64, scratch_operands = 0 : i64, tpu.core_type = #tpu.core_type<tc>, window_params = [{transform_indices = @transform_0, window_bounds = array<i64: 8, 8, 384>}, {transform_indices = @transform_1, window_bounds = array<i64: 8, 128>}, {pipeline_mode = #tpu.pipeline_mode<synchronous>, transform_indices = @transform_2, window_bounds = array<i64: 128, 384>}, {pipeline_mode = #tpu.pipeline_mode<synchronous>, transform_indices = @transform_3, window_bounds = array<i64: 1, 128>}, {transform_indices = @transform_4, window_bounds = array<i64: 8, 8, 128>}]} {
    %c0 = arith.constant 0 : index
    %c0_0 = arith.constant 0 : index
    %0 = vector.load %arg3[%c0, %c0_0] : memref<128x384xbf16, #tpu.memory_space<vmem>>, vector<128x384xbf16>
    %c0_1 = arith.constant 0 : index
    %c0_2 = arith.constant 0 : index
    %1 = vector.load %arg4[%c0_1, %c0_2] : memref<1x128xf32, #tpu.memory_space<vmem>>, vector<1x128xf32>
    %c0_3 = arith.constant 0 : index
    %c0_4 = arith.constant 0 : index
    %2 = vector.load %arg2[%c0_3, %c0_4] : memref<8x128xf32, #tpu.memory_space<vmem>>, vector<8x128xf32>
    %c0_i32 = arith.constant 0 : i32
    %3 = arith.index_cast %c0_i32 : i32 to index
    %c0_5 = arith.constant 0 : index
    %c0_6 = arith.constant 0 : index
    %4 = vector.load %arg1[%3, %c0_5, %c0_6] : memref<8x8x384xf32, #tpu.memory_space<vmem>>, vector<1x8x384xf32>
    %5 = vector.shape_cast %4 : vector<1x8x384xf32> to vector<8x384xf32>
    %6 = arith.truncf %2 : vector<8x128xf32> to vector<8x128xbf16>
    %cst = arith.constant dense<0.000000e+00> : vector<8x384xf32>
    %7 = tpu.matmul %6, %0, %cst {dimension_numbers = #tpu.dot_dimension_numbers<[1], [0], [0], [1], [0, 0, 1, 1], [], []>} : vector<8x128xbf16>, vector<128x384xbf16>, vector<8x384xf32> -> vector<8x384xf32>
    %8 = vector.extract_strided_slice %5 {offsets = [0, 0], sizes = [8, 128], strides = [1, 1]} : vector<8x384xf32> to vector<8x128xf32>
    %9 = vector.extract_strided_slice %7 {offsets = [0, 0], sizes = [8, 128], strides = [1, 1]} : vector<8x384xf32> to vector<8x128xf32>
    %10 = arith.addf %8, %9 : vector<8x128xf32>
    %11 = arith.negf %10 : vector<8x128xf32>
    %12 = math.exp %11 : vector<8x128xf32>
    %cst_7 = arith.constant 1.000000e+00 : f32
    %13 = vector.broadcast %cst_7 : f32 to vector<8x128xf32>
    %14 = arith.addf %13, %12 : vector<8x128xf32>
    %15 = arith.divf %13, %14 : vector<8x128xf32>
    %16 = vector.extract_strided_slice %5 {offsets = [0, 128], sizes = [8, 128], strides = [1, 1]} : vector<8x384xf32> to vector<8x128xf32>
    %17 = vector.extract_strided_slice %7 {offsets = [0, 128], sizes = [8, 128], strides = [1, 1]} : vector<8x384xf32> to vector<8x128xf32>
    %18 = arith.addf %16, %17 : vector<8x128xf32>
    %19 = arith.negf %18 : vector<8x128xf32>
    %20 = math.exp %19 : vector<8x128xf32>
    %cst_8 = arith.constant 1.000000e+00 : f32
    %21 = vector.broadcast %cst_8 : f32 to vector<8x128xf32>
    %22 = arith.addf %21, %20 : vector<8x128xf32>
    %23 = arith.divf %21, %22 : vector<8x128xf32>
    %24 = vector.extract_strided_slice %5 {offsets = [0, 256], sizes = [8, 128], strides = [1, 1]} : vector<8x384xf32> to vector<8x128xf32>
    %25 = vector.extract_strided_slice %7 {offsets = [0, 256], sizes = [8, 128], strides = [1, 1]} : vector<8x384xf32> to vector<8x128xf32>
    %26 = vector.broadcast %1 : vector<1x128xf32> to vector<8x128xf32>
    %27 = arith.addf %25, %26 : vector<8x128xf32>
    %28 = arith.mulf %15, %27 : vector<8x128xf32>
    %29 = arith.addf %24, %28 : vector<8x128xf32>
    %30 = math.tanh %29 : vector<8x128xf32>
    %cst_9 = arith.constant 1.000000e+00 : f32
    %31 = vector.broadcast %cst_9 : f32 to vector<8x128xf32>
    %32 = arith.subf %31, %23 : vector<8x128xf32>
    %33 = arith.mulf %32, %30 : vector<8x128xf32>
    %34 = arith.mulf %23, %2 : vector<8x128xf32>
    %35 = arith.addf %33, %34 : vector<8x128xf32>
    %36 = arith.index_cast %c0_i32 : i32 to index
    %c0_10 = arith.constant 0 : index
    %c0_11 = arith.constant 0 : index
    %37 = vector.load %arg5[%36, %c0_10, %c0_11] : memref<8x8x128xf32, #tpu.memory_space<vmem>>, vector<1x8x128xf32>
    %38 = vector.shape_cast %37 : vector<1x8x128xf32> to vector<8x128xf32>
    %39 = vector.shape_cast %35 : vector<8x128xf32> to vector<1x8x128xf32>
    tpu.vector_store %arg5[%36, %c0_10, %c0_11], %39 {strides = array<i32>} : memref<8x8x128xf32, #tpu.memory_space<vmem>>, vector<1x8x128xf32>,
    %c1_i32 = arith.constant 1 : i32
    %40 = arith.index_cast %c1_i32 : i32 to index
    %c0_12 = arith.constant 0 : index
    %c0_13 = arith.constant 0 : index
    %41 = vector.load %arg1[%40, %c0_12, %c0_13] : memref<8x8x384xf32, #tpu.memory_space<vmem>>, vector<1x8x384xf32>
    %42 = vector.shape_cast %41 : vector<1x8x384xf32> to vector<8x384xf32>
    %43 = arith.truncf %35 : vector<8x128xf32> to vector<8x128xbf16>
    %cst_14 = arith.constant dense<0.000000e+00> : vector<8x384xf32>
    %44 = tpu.matmul %43, %0, %cst_14 {dimension_numbers = #tpu.dot_dimension_numbers<[1], [0], [0], [1], [0, 0, 1, 1], [], []>} : vector<8x128xbf16>, vector<128x384xbf16>, vector<8x384xf32> -> vector<8x384xf32>
    %45 = vector.extract_strided_slice %42 {offsets = [0, 0], sizes = [8, 128], strides = [1, 1]} : vector<8x384xf32> to vector<8x128xf32>
    %46 = vector.extract_strided_slice %44 {offsets = [0, 0], sizes = [8, 128], strides = [1, 1]} : vector<8x384xf32> to vector<8x128xf32>
    %47 = arith.addf %45, %46 : vector<8x128xf32>
    %48 = arith.negf %47 : vector<8x128xf32>
    %49 = math.exp %48 : vector<8x128xf32>
    %cst_15 = arith.constant 1.000000e+00 : f32
    %50 = vector.broadcast %cst_15 : f32 to vector<8x128xf32>
    %51 = arith.addf %50, %49 : vector<8x128xf32>
    %52 = arith.divf %50, %51 : vector<8x128xf32>
    %53 = vector.extract_strided_slice %42 {offsets = [0, 128], sizes = [8, 128], strides = [1, 1]} : vector<8x384xf32> to vector<8x128xf32>
    %54 = vector.extract_strided_slice %44 {offsets = [0, 128], sizes = [8, 128], strides = [1, 1]} : vector<8x384xf32> to vector<8x128xf32>
    %55 = arith.addf %53, %54 : vector<8x128xf32>
    %56 = arith.negf %55 : vector<8x128xf32>
    %57 = math.exp %56 : vector<8x128xf32>
    %cst_16 = arith.constant 1.000000e+00 : f32
    %58 = vector.broadcast %cst_16 : f32 to vector<8x128xf32>
    %59 = arith.addf %58, %57 : vector<8x128xf32>
    %60 = arith.divf %58, %59 : vector<8x128xf32>
    %61 = vector.extract_strided_slice %42 {offsets = [0, 256], sizes = [8, 128], strides = [1, 1]} : vector<8x384xf32> to vector<8x128xf32>
    %62 = vector.extract_strided_slice %44 {offsets = [0, 256], sizes = [8, 128], strides = [1, 1]} : vector<8x384xf32> to vector<8x128xf32>
    %63 = vector.broadcast %1 : vector<1x128xf32> to vector<8x128xf32>
    %64 = arith.addf %62, %63 : vector<8x128xf32>
    %65 = arith.mulf %52, %64 : vector<8x128xf32>
    %66 = arith.addf %61, %65 : vector<8x128xf32>
    %67 = math.tanh %66 : vector<8x128xf32>
    %cst_17 = arith.constant 1.000000e+00 : f32
    %68 = vector.broadcast %cst_17 : f32 to vector<8x128xf32>
    %69 = arith.subf %68, %60 : vector<8x128xf32>
    %70 = arith.mulf %69, %67 : vector<8x128xf32>
    %71 = arith.mulf %60, %35 : vector<8x128xf32>
    %72 = arith.addf %70, %71 : vector<8x128xf32>
    %73 = arith.index_cast %c1_i32 : i32 to index
    %c0_18 = arith.constant 0 : index
    %c0_19 = arith.constant 0 : index
    %74 = vector.load %arg5[%73, %c0_18, %c0_19] : memref<8x8x128xf32, #tpu.memory_space<vmem>>, vector<1x8x128xf32>
    %75 = vector.shape_cast %74 : vector<1x8x128xf32> to vector<8x128xf32>
    %76 = vector.shape_cast %72 : vector<8x128xf32> to vector<1x8x128xf32>
    tpu.vector_store %arg5[%73, %c0_18, %c0_19], %76 {strides = array<i32>} : memref<8x8x128xf32, #tpu.memory_space<vmem>>, vector<1x8x128xf32>,
    %c2_i32 = arith.constant 2 : i32
    %77 = arith.index_cast %c2_i32 : i32 to index
    %c0_20 = arith.constant 0 : index
    %c0_21 = arith.constant 0 : index
    %78 = vector.load %arg1[%77, %c0_20, %c0_21] : memref<8x8x384xf32, #tpu.memory_space<vmem>>, vector<1x8x384xf32>
    %79 = vector.shape_cast %78 : vector<1x8x384xf32> to vector<8x384xf32>
    %80 = arith.truncf %72 : vector<8x128xf32> to vector<8x128xbf16>
    %cst_22 = arith.constant dense<0.000000e+00> : vector<8x384xf32>
    %81 = tpu.matmul %80, %0, %cst_22 {dimension_numbers = #tpu.dot_dimension_numbers<[1], [0], [0], [1], [0, 0, 1, 1], [], []>} : vector<8x128xbf16>, vector<128x384xbf16>, vector<8x384xf32> -> vector<8x384xf32>
    %82 = vector.extract_strided_slice %79 {offsets = [0, 0], sizes = [8, 128], strides = [1, 1]} : vector<8x384xf32> to vector<8x128xf32>
    %83 = vector.extract_strided_slice %81 {offsets = [0, 0], sizes = [8, 128], strides = [1, 1]} : vector<8x384xf32> to vector<8x128xf32>
    %84 = arith.addf %82, %83 : vector<8x128xf32>
    %85 = arith.negf %84 : vector<8x128xf32>
    %86 = math.exp %85 : vector<8x128xf32>
    %cst_23 = arith.constant 1.000000e+00 : f32
    %87 = vector.broadcast %cst_23 : f32 to vector<8x128xf32>
    %88 = arith.addf %87, %86 : vector<8x128xf32>
    %89 = arith.divf %87, %88 : vector<8x128xf32>
    %90 = vector.extract_strided_slice %79 {offsets = [0, 128], sizes = [8, 128], strides = [1, 1]} : vector<8x384xf32> to vector<8x128xf32>
    %91 = vector.extract_strided_slice %81 {offsets = [0, 128], sizes = [8, 128], strides = [1, 1]} : vector<8x384xf32> to vector<8x128xf32>
    %92 = arith.addf %90, %91 : vector<8x128xf32>
    %93 = arith.negf %92 : vector<8x128xf32>
    %94 = math.exp %93 : vector<8x128xf32>
    %cst_24 = arith.constant 1.000000e+00 : f32
    %95 = vector.broadcast %cst_24 : f32 to vector<8x128xf32>
    %96 = arith.addf %95, %94 : vector<8x128xf32>
    %97 = arith.divf %95, %96 : vector<8x128xf32>
    %98 = vector.extract_strided_slice %79 {offsets = [0, 256], sizes = [8, 128], strides = [1, 1]} : vector<8x384xf32> to vector<8x128xf32>
    %99 = vector.extract_strided_slice %81 {offsets = [0, 256], sizes = [8, 128], strides = [1, 1]} : vector<8x384xf32> to vector<8x128xf32>
    %100 = vector.broadcast %1 : vector<1x128xf32> to vector<8x128xf32>
    %101 = arith.addf %99, %100 : vector<8x128xf32>
    %102 = arith.mulf %89, %101 : vector<8x128xf32>
    %103 = arith.addf %98, %102 : vector<8x128xf32>
    %104 = math.tanh %103 : vector<8x128xf32>
    %cst_25 = arith.constant 1.000000e+00 : f32
    %105 = vector.broadcast %cst_25 : f32 to vector<8x128xf32>
    %106 = arith.subf %105, %97 : vector<8x128xf32>
    %107 = arith.mulf %106, %104 : vector<8x128xf32>
    %108 = arith.mulf %97, %72 : vector<8x128xf32>
    %109 = arith.addf %107, %108 : vector<8x128xf32>
    %110 = arith.index_cast %c2_i32 : i32 to index
    %c0_26 = arith.constant 0 : index
    %c0_27 = arith.constant 0 : index
    %111 = vector.load %arg5[%110, %c0_26, %c0_27] : memref<8x8x128xf32, #tpu.memory_space<vmem>>, vector<1x8x128xf32>
    %112 = vector.shape_cast %111 : vector<1x8x128xf32> to vector<8x128xf32>
    %113 = vector.shape_cast %109 : vector<8x128xf32> to vector<1x8x128xf32>
    tpu.vector_store %arg5[%110, %c0_26, %c0_27], %113 {strides = array<i32>} : memref<8x8x128xf32, #tpu.memory_space<vmem>>, vector<1x8x128xf32>,
    %c3_i32 = arith.constant 3 : i32
    %114 = arith.index_cast %c3_i32 : i32 to index
    %c0_28 = arith.constant 0 : index
    %c0_29 = arith.constant 0 : index
    %115 = vector.load %arg1[%114, %c0_28, %c0_29] : memref<8x8x384xf32, #tpu.memory_space<vmem>>, vector<1x8x384xf32>
    %116 = vector.shape_cast %115 : vector<1x8x384xf32> to vector<8x384xf32>
    %117 = arith.truncf %109 : vector<8x128xf32> to vector<8x128xbf16>
    %cst_30 = arith.constant dense<0.000000e+00> : vector<8x384xf32>
    %118 = tpu.matmul %117, %0, %cst_30 {dimension_numbers = #tpu.dot_dimension_numbers<[1], [0], [0], [1], [0, 0, 1, 1], [], []>} : vector<8x128xbf16>, vector<128x384xbf16>, vector<8x384xf32> -> vector<8x384xf32>
    %119 = vector.extract_strided_slice %116 {offsets = [0, 0], sizes = [8, 128], strides = [1, 1]} : vector<8x384xf32> to vector<8x128xf32>
    %120 = vector.extract_strided_slice %118 {offsets = [0, 0], sizes = [8, 128], strides = [1, 1]} : vector<8x384xf32> to vector<8x128xf32>
    %121 = arith.addf %119, %120 : vector<8x128xf32>
    %122 = arith.negf %121 : vector<8x128xf32>
    %123 = math.exp %122 : vector<8x128xf32>
    %cst_31 = arith.constant 1.000000e+00 : f32
    %124 = vector.broadcast %cst_31 : f32 to vector<8x128xf32>
    %125 = arith.addf %124, %123 : vector<8x128xf32>
    %126 = arith.divf %124, %125 : vector<8x128xf32>
    %127 = vector.extract_strided_slice %116 {offsets = [0, 128], sizes = [8, 128], strides = [1, 1]} : vector<8x384xf32> to vector<8x128xf32>
    %128 = vector.extract_strided_slice %118 {offsets = [0, 128], sizes = [8, 128], strides = [1, 1]} : vector<8x384xf32> to vector<8x128xf32>
    %129 = arith.addf %127, %128 : vector<8x128xf32>
    %130 = arith.negf %129 : vector<8x128xf32>
    %131 = math.exp %130 : vector<8x128xf32>
    %cst_32 = arith.constant 1.000000e+00 : f32
    %132 = vector.broadcast %cst_32 : f32 to vector<8x128xf32>
    %133 = arith.addf %132, %131 : vector<8x128xf32>
    %134 = arith.divf %132, %133 : vector<8x128xf32>
    %135 = vector.extract_strided_slice %116 {offsets = [0, 256], sizes = [8, 128], strides = [1, 1]} : vector<8x384xf32> to vector<8x128xf32>
    %136 = vector.extract_strided_slice %118 {offsets = [0, 256], sizes = [8, 128], strides = [1, 1]} : vector<8x384xf32> to vector<8x128xf32>
    %137 = vector.broadcast %1 : vector<1x128xf32> to vector<8x128xf32>
    %138 = arith.addf %136, %137 : vector<8x128xf32>
    %139 = arith.mulf %126, %138 : vector<8x128xf32>
    %140 = arith.addf %135, %139 : vector<8x128xf32>
    %141 = math.tanh %140 : vector<8x128xf32>
    %cst_33 = arith.constant 1.000000e+00 : f32
    %142 = vector.broadcast %cst_33 : f32 to vector<8x128xf32>
    %143 = arith.subf %142, %134 : vector<8x128xf32>
    %144 = arith.mulf %143, %141 : vector<8x128xf32>
    %145 = arith.mulf %134, %109 : vector<8x128xf32>
    %146 = arith.addf %144, %145 : vector<8x128xf32>
    %147 = arith.index_cast %c3_i32 : i32 to index
    %c0_34 = arith.constant 0 : index
    %c0_35 = arith.constant 0 : index
    %148 = vector.load %arg5[%147, %c0_34, %c0_35] : memref<8x8x128xf32, #tpu.memory_space<vmem>>, vector<1x8x128xf32>
    %149 = vector.shape_cast %148 : vector<1x8x128xf32> to vector<8x128xf32>
    %150 = vector.shape_cast %146 : vector<8x128xf32> to vector<1x8x128xf32>
    tpu.vector_store %arg5[%147, %c0_34, %c0_35], %150 {strides = array<i32>} : memref<8x8x128xf32, #tpu.memory_space<vmem>>, vector<1x8x128xf32>,
    %c4_i32 = arith.constant 4 : i32
    %151 = arith.index_cast %c4_i32 : i32 to index
    %c0_36 = arith.constant 0 : index
    %c0_37 = arith.constant 0 : index
    %152 = vector.load %arg1[%151, %c0_36, %c0_37] : memref<8x8x384xf32, #tpu.memory_space<vmem>>, vector<1x8x384xf32>
    %153 = vector.shape_cast %152 : vector<1x8x384xf32> to vector<8x384xf32>
    %154 = arith.truncf %146 : vector<8x128xf32> to vector<8x128xbf16>
    %cst_38 = arith.constant dense<0.000000e+00> : vector<8x384xf32>
    %155 = tpu.matmul %154, %0, %cst_38 {dimension_numbers = #tpu.dot_dimension_numbers<[1], [0], [0], [1], [0, 0, 1, 1], [], []>} : vector<8x128xbf16>, vector<128x384xbf16>, vector<8x384xf32> -> vector<8x384xf32>
    %156 = vector.extract_strided_slice %153 {offsets = [0, 0], sizes = [8, 128], strides = [1, 1]} : vector<8x384xf32> to vector<8x128xf32>
    %157 = vector.extract_strided_slice %155 {offsets = [0, 0], sizes = [8, 128], strides = [1, 1]} : vector<8x384xf32> to vector<8x128xf32>
    %158 = arith.addf %156, %157 : vector<8x128xf32>
    %159 = arith.negf %158 : vector<8x128xf32>
    %160 = math.exp %159 : vector<8x128xf32>
    %cst_39 = arith.constant 1.000000e+00 : f32
    %161 = vector.broadcast %cst_39 : f32 to vector<8x128xf32>
    %162 = arith.addf %161, %160 : vector<8x128xf32>
    %163 = arith.divf %161, %162 : vector<8x128xf32>
    %164 = vector.extract_strided_slice %153 {offsets = [0, 128], sizes = [8, 128], strides = [1, 1]} : vector<8x384xf32> to vector<8x128xf32>
    %165 = vector.extract_strided_slice %155 {offsets = [0, 128], sizes = [8, 128], strides = [1, 1]} : vector<8x384xf32> to vector<8x128xf32>
    %166 = arith.addf %164, %165 : vector<8x128xf32>
    %167 = arith.negf %166 : vector<8x128xf32>
    %168 = math.exp %167 : vector<8x128xf32>
    %cst_40 = arith.constant 1.000000e+00 : f32
    %169 = vector.broadcast %cst_40 : f32 to vector<8x128xf32>
    %170 = arith.addf %169, %168 : vector<8x128xf32>
    %171 = arith.divf %169, %170 : vector<8x128xf32>
    %172 = vector.extract_strided_slice %153 {offsets = [0, 256], sizes = [8, 128], strides = [1, 1]} : vector<8x384xf32> to vector<8x128xf32>
    %173 = vector.extract_strided_slice %155 {offsets = [0, 256], sizes = [8, 128], strides = [1, 1]} : vector<8x384xf32> to vector<8x128xf32>
    %174 = vector.broadcast %1 : vector<1x128xf32> to vector<8x128xf32>
    %175 = arith.addf %173, %174 : vector<8x128xf32>
    %176 = arith.mulf %163, %175 : vector<8x128xf32>
    %177 = arith.addf %172, %176 : vector<8x128xf32>
    %178 = math.tanh %177 : vector<8x128xf32>
    %cst_41 = arith.constant 1.000000e+00 : f32
    %179 = vector.broadcast %cst_41 : f32 to vector<8x128xf32>
    %180 = arith.subf %179, %171 : vector<8x128xf32>
    %181 = arith.mulf %180, %178 : vector<8x128xf32>
    %182 = arith.mulf %171, %146 : vector<8x128xf32>
    %183 = arith.addf %181, %182 : vector<8x128xf32>
    %184 = arith.index_cast %c4_i32 : i32 to index
    %c0_42 = arith.constant 0 : index
    %c0_43 = arith.constant 0 : index
    %185 = vector.load %arg5[%184, %c0_42, %c0_43] : memref<8x8x128xf32, #tpu.memory_space<vmem>>, vector<1x8x128xf32>
    %186 = vector.shape_cast %185 : vector<1x8x128xf32> to vector<8x128xf32>
    %187 = vector.shape_cast %183 : vector<8x128xf32> to vector<1x8x128xf32>
    tpu.vector_store %arg5[%184, %c0_42, %c0_43], %187 {strides = array<i32>} : memref<8x8x128xf32, #tpu.memory_space<vmem>>, vector<1x8x128xf32>,
    %c5_i32 = arith.constant 5 : i32
    %188 = arith.index_cast %c5_i32 : i32 to index
    %c0_44 = arith.constant 0 : index
    %c0_45 = arith.constant 0 : index
    %189 = vector.load %arg1[%188, %c0_44, %c0_45] : memref<8x8x384xf32, #tpu.memory_space<vmem>>, vector<1x8x384xf32>
    %190 = vector.shape_cast %189 : vector<1x8x384xf32> to vector<8x384xf32>
    %191 = arith.truncf %183 : vector<8x128xf32> to vector<8x128xbf16>
    %cst_46 = arith.constant dense<0.000000e+00> : vector<8x384xf32>
    %192 = tpu.matmul %191, %0, %cst_46 {dimension_numbers = #tpu.dot_dimension_numbers<[1], [0], [0], [1], [0, 0, 1, 1], [], []>} : vector<8x128xbf16>, vector<128x384xbf16>, vector<8x384xf32> -> vector<8x384xf32>
    %193 = vector.extract_strided_slice %190 {offsets = [0, 0], sizes = [8, 128], strides = [1, 1]} : vector<8x384xf32> to vector<8x128xf32>
    %194 = vector.extract_strided_slice %192 {offsets = [0, 0], sizes = [8, 128], strides = [1, 1]} : vector<8x384xf32> to vector<8x128xf32>
    %195 = arith.addf %193, %194 : vector<8x128xf32>
    %196 = arith.negf %195 : vector<8x128xf32>
    %197 = math.exp %196 : vector<8x128xf32>
    %cst_47 = arith.constant 1.000000e+00 : f32
    %198 = vector.broadcast %cst_47 : f32 to vector<8x128xf32>
    %199 = arith.addf %198, %197 : vector<8x128xf32>
    %200 = arith.divf %198, %199 : vector<8x128xf32>
    %201 = vector.extract_strided_slice %190 {offsets = [0, 128], sizes = [8, 128], strides = [1, 1]} : vector<8x384xf32> to vector<8x128xf32>
    %202 = vector.extract_strided_slice %192 {offsets = [0, 128], sizes = [8, 128], strides = [1, 1]} : vector<8x384xf32> to vector<8x128xf32>
    %203 = arith.addf %201, %202 : vector<8x128xf32>
    %204 = arith.negf %203 : vector<8x128xf32>
    %205 = math.exp %204 : vector<8x128xf32>
    %cst_48 = arith.constant 1.000000e+00 : f32
    %206 = vector.broadcast %cst_48 : f32 to vector<8x128xf32>
    %207 = arith.addf %206, %205 : vector<8x128xf32>
    %208 = arith.divf %206, %207 : vector<8x128xf32>
    %209 = vector.extract_strided_slice %190 {offsets = [0, 256], sizes = [8, 128], strides = [1, 1]} : vector<8x384xf32> to vector<8x128xf32>
    %210 = vector.extract_strided_slice %192 {offsets = [0, 256], sizes = [8, 128], strides = [1, 1]} : vector<8x384xf32> to vector<8x128xf32>
    %211 = vector.broadcast %1 : vector<1x128xf32> to vector<8x128xf32>
    %212 = arith.addf %210, %211 : vector<8x128xf32>
    %213 = arith.mulf %200, %212 : vector<8x128xf32>
    %214 = arith.addf %209, %213 : vector<8x128xf32>
    %215 = math.tanh %214 : vector<8x128xf32>
    %cst_49 = arith.constant 1.000000e+00 : f32
    %216 = vector.broadcast %cst_49 : f32 to vector<8x128xf32>
    %217 = arith.subf %216, %208 : vector<8x128xf32>
    %218 = arith.mulf %217, %215 : vector<8x128xf32>
    %219 = arith.mulf %208, %183 : vector<8x128xf32>
    %220 = arith.addf %218, %219 : vector<8x128xf32>
    %221 = arith.index_cast %c5_i32 : i32 to index
    %c0_50 = arith.constant 0 : index
    %c0_51 = arith.constant 0 : index
    %222 = vector.load %arg5[%221, %c0_50, %c0_51] : memref<8x8x128xf32, #tpu.memory_space<vmem>>, vector<1x8x128xf32>
    %223 = vector.shape_cast %222 : vector<1x8x128xf32> to vector<8x128xf32>
    %224 = vector.shape_cast %220 : vector<8x128xf32> to vector<1x8x128xf32>
    tpu.vector_store %arg5[%221, %c0_50, %c0_51], %224 {strides = array<i32>} : memref<8x8x128xf32, #tpu.memory_space<vmem>>, vector<1x8x128xf32>,
    %c6_i32 = arith.constant 6 : i32
    %225 = arith.index_cast %c6_i32 : i32 to index
    %c0_52 = arith.constant 0 : index
    %c0_53 = arith.constant 0 : index
    %226 = vector.load %arg1[%225, %c0_52, %c0_53] : memref<8x8x384xf32, #tpu.memory_space<vmem>>, vector<1x8x384xf32>
    %227 = vector.shape_cast %226 : vector<1x8x384xf32> to vector<8x384xf32>
    %228 = arith.truncf %220 : vector<8x128xf32> to vector<8x128xbf16>
    %cst_54 = arith.constant dense<0.000000e+00> : vector<8x384xf32>
    %229 = tpu.matmul %228, %0, %cst_54 {dimension_numbers = #tpu.dot_dimension_numbers<[1], [0], [0], [1], [0, 0, 1, 1], [], []>} : vector<8x128xbf16>, vector<128x384xbf16>, vector<8x384xf32> -> vector<8x384xf32>
    %230 = vector.extract_strided_slice %227 {offsets = [0, 0], sizes = [8, 128], strides = [1, 1]} : vector<8x384xf32> to vector<8x128xf32>
    %231 = vector.extract_strided_slice %229 {offsets = [0, 0], sizes = [8, 128], strides = [1, 1]} : vector<8x384xf32> to vector<8x128xf32>
    %232 = arith.addf %230, %231 : vector<8x128xf32>
    %233 = arith.negf %232 : vector<8x128xf32>
    %234 = math.exp %233 : vector<8x128xf32>
    %cst_55 = arith.constant 1.000000e+00 : f32
    %235 = vector.broadcast %cst_55 : f32 to vector<8x128xf32>
    %236 = arith.addf %235, %234 : vector<8x128xf32>
    %237 = arith.divf %235, %236 : vector<8x128xf32>
    %238 = vector.extract_strided_slice %227 {offsets = [0, 128], sizes = [8, 128], strides = [1, 1]} : vector<8x384xf32> to vector<8x128xf32>
    %239 = vector.extract_strided_slice %229 {offsets = [0, 128], sizes = [8, 128], strides = [1, 1]} : vector<8x384xf32> to vector<8x128xf32>
    %240 = arith.addf %238, %239 : vector<8x128xf32>
    %241 = arith.negf %240 : vector<8x128xf32>
    %242 = math.exp %241 : vector<8x128xf32>
    %cst_56 = arith.constant 1.000000e+00 : f32
    %243 = vector.broadcast %cst_56 : f32 to vector<8x128xf32>
    %244 = arith.addf %243, %242 : vector<8x128xf32>
    %245 = arith.divf %243, %244 : vector<8x128xf32>
    %246 = vector.extract_strided_slice %227 {offsets = [0, 256], sizes = [8, 128], strides = [1, 1]} : vector<8x384xf32> to vector<8x128xf32>
    %247 = vector.extract_strided_slice %229 {offsets = [0, 256], sizes = [8, 128], strides = [1, 1]} : vector<8x384xf32> to vector<8x128xf32>
    %248 = vector.broadcast %1 : vector<1x128xf32> to vector<8x128xf32>
    %249 = arith.addf %247, %248 : vector<8x128xf32>
    %250 = arith.mulf %237, %249 : vector<8x128xf32>
    %251 = arith.addf %246, %250 : vector<8x128xf32>
    %252 = math.tanh %251 : vector<8x128xf32>
    %cst_57 = arith.constant 1.000000e+00 : f32
    %253 = vector.broadcast %cst_57 : f32 to vector<8x128xf32>
    %254 = arith.subf %253, %245 : vector<8x128xf32>
    %255 = arith.mulf %254, %252 : vector<8x128xf32>
    %256 = arith.mulf %245, %220 : vector<8x128xf32>
    %257 = arith.addf %255, %256 : vector<8x128xf32>
    %258 = arith.index_cast %c6_i32 : i32 to index
    %c0_58 = arith.constant 0 : index
    %c0_59 = arith.constant 0 : index
    %259 = vector.load %arg5[%258, %c0_58, %c0_59] : memref<8x8x128xf32, #tpu.memory_space<vmem>>, vector<1x8x128xf32>
    %260 = vector.shape_cast %259 : vector<1x8x128xf32> to vector<8x128xf32>
    %261 = vector.shape_cast %257 : vector<8x128xf32> to vector<1x8x128xf32>
    tpu.vector_store %arg5[%258, %c0_58, %c0_59], %261 {strides = array<i32>} : memref<8x8x128xf32, #tpu.memory_space<vmem>>, vector<1x8x128xf32>,
    %c7_i32 = arith.constant 7 : i32
    %262 = arith.index_cast %c7_i32 : i32 to index
    %c0_60 = arith.constant 0 : index
    %c0_61 = arith.constant 0 : index
    %263 = vector.load %arg1[%262, %c0_60, %c0_61] : memref<8x8x384xf32, #tpu.memory_space<vmem>>, vector<1x8x384xf32>
    %264 = vector.shape_cast %263 : vector<1x8x384xf32> to vector<8x384xf32>
    %265 = arith.truncf %257 : vector<8x128xf32> to vector<8x128xbf16>
    %cst_62 = arith.constant dense<0.000000e+00> : vector<8x384xf32>
    %266 = tpu.matmul %265, %0, %cst_62 {dimension_numbers = #tpu.dot_dimension_numbers<[1], [0], [0], [1], [0, 0, 1, 1], [], []>} : vector<8x128xbf16>, vector<128x384xbf16>, vector<8x384xf32> -> vector<8x384xf32>
    %267 = vector.extract_strided_slice %264 {offsets = [0, 0], sizes = [8, 128], strides = [1, 1]} : vector<8x384xf32> to vector<8x128xf32>
    %268 = vector.extract_strided_slice %266 {offsets = [0, 0], sizes = [8, 128], strides = [1, 1]} : vector<8x384xf32> to vector<8x128xf32>
    %269 = arith.addf %267, %268 : vector<8x128xf32>
    %270 = arith.negf %269 : vector<8x128xf32>
    %271 = math.exp %270 : vector<8x128xf32>
    %cst_63 = arith.constant 1.000000e+00 : f32
    %272 = vector.broadcast %cst_63 : f32 to vector<8x128xf32>
    %273 = arith.addf %272, %271 : vector<8x128xf32>
    %274 = arith.divf %272, %273 : vector<8x128xf32>
    %275 = vector.extract_strided_slice %264 {offsets = [0, 128], sizes = [8, 128], strides = [1, 1]} : vector<8x384xf32> to vector<8x128xf32>
    %276 = vector.extract_strided_slice %266 {offsets = [0, 128], sizes = [8, 128], strides = [1, 1]} : vector<8x384xf32> to vector<8x128xf32>
    %277 = arith.addf %275, %276 : vector<8x128xf32>
    %278 = arith.negf %277 : vector<8x128xf32>
    %279 = math.exp %278 : vector<8x128xf32>
    %cst_64 = arith.constant 1.000000e+00 : f32
    %280 = vector.broadcast %cst_64 : f32 to vector<8x128xf32>
    %281 = arith.addf %280, %279 : vector<8x128xf32>
    %282 = arith.divf %280, %281 : vector<8x128xf32>
    %283 = vector.extract_strided_slice %264 {offsets = [0, 256], sizes = [8, 128], strides = [1, 1]} : vector<8x384xf32> to vector<8x128xf32>
    %284 = vector.extract_strided_slice %266 {offsets = [0, 256], sizes = [8, 128], strides = [1, 1]} : vector<8x384xf32> to vector<8x128xf32>
    %285 = vector.broadcast %1 : vector<1x128xf32> to vector<8x128xf32>
    %286 = arith.addf %284, %285 : vector<8x128xf32>
    %287 = arith.mulf %274, %286 : vector<8x128xf32>
    %288 = arith.addf %283, %287 : vector<8x128xf32>
    %289 = math.tanh %288 : vector<8x128xf32>
    %cst_65 = arith.constant 1.000000e+00 : f32
    %290 = vector.broadcast %cst_65 : f32 to vector<8x128xf32>
    %291 = arith.subf %290, %282 : vector<8x128xf32>
    %292 = arith.mulf %291, %289 : vector<8x128xf32>
    %293 = arith.mulf %282, %257 : vector<8x128xf32>
    %294 = arith.addf %292, %293 : vector<8x128xf32>
    %295 = arith.index_cast %c7_i32 : i32 to index
    %c0_66 = arith.constant 0 : index
    %c0_67 = arith.constant 0 : index
    %296 = vector.load %arg5[%295, %c0_66, %c0_67] : memref<8x8x128xf32, #tpu.memory_space<vmem>>, vector<1x8x128xf32>
    %297 = vector.shape_cast %296 : vector<1x8x128xf32> to vector<8x128xf32>
    %298 = vector.shape_cast %294 : vector<8x128xf32> to vector<1x8x128xf32>
    tpu.vector_store %arg5[%295, %c0_66, %c0_67], %298 {strides = array<i32>} : memref<8x8x128xf32, #tpu.memory_space<vmem>>, vector<1x8x128xf32>,
    %c8_i32 = arith.constant 8 : i32
    return
  }
  func.func @transform_0(%arg0: i32) -> (i32, i32, i32) {
    %c0_i32 = arith.constant 0 : i32
    %c0_i32_0 = arith.constant 0 : i32
    %c0_i32_1 = arith.constant 0 : i32
    return %c0_i32, %arg0, %c0_i32_0 : i32, i32, i32
  }
  func.func @transform_1(%arg0: i32) -> (i32, i32) {
    %c0_i32 = arith.constant 0 : i32
    %c0_i32_0 = arith.constant 0 : i32
    return %arg0, %c0_i32 : i32, i32
  }
  func.func @transform_2(%arg0: i32) -> (i32, i32) {
    %c0_i32 = arith.constant 0 : i32
    %c0_i32_0 = arith.constant 0 : i32
    %c0_i32_1 = arith.constant 0 : i32
    return %c0_i32, %c0_i32_0 : i32, i32
  }
  func.func @transform_3(%arg0: i32) -> (i32, i32) {
    %c0_i32 = arith.constant 0 : i32
    %c0_i32_0 = arith.constant 0 : i32
    %c0_i32_1 = arith.constant 0 : i32
    return %c0_i32, %c0_i32_0 : i32, i32
  }
  func.func @transform_4(%arg0: i32) -> (i32, i32, i32) {
    %c0_i32 = arith.constant 0 : i32
    %c0_i32_0 = arith.constant 0 : i32
    %c0_i32_1 = arith.constant 0 : i32
    return %c0_i32, %arg0, %c0_i32_0 : i32, i32, i32
  }
}

</mosaic_0001>

<bundles_post_ra>
// kernel: _gru_forward_impl.1
= control target key start
LH: loop header
LB: loop body
LE: loop exit
PB: predicated region body
PF: predicated region fallthrough
CT: control target
= control target key end

     0   :  { %v1491_v1 = vmov 0.0   ;;  %v1492_v2 = vmov 0   ;;  %vm1493_vm0 = vmmov 0   ;;  %s2086_s2 = inlined_call_operand.vmem [shape: bf16[128,384], index: 2, kind: input, shape index: {}]   ;;  %s2087_s1 = inlined_call_operand.vmem [shape: f32[8,128], index: 1, kind: input, shape index: {}]   ;;  %s2088_s0 = inlined_call_operand.vmem [shape: f32[8,8,384], index: 0, kind: input, shape index: {}]   ;;  %s2089_s3 = inlined_call_operand.vmem [shape: f32[1,128], index: 3, kind: input, shape index: {}]   ;;  %s2090_s4 = inlined_call_operand.vmem [shape: f32[8,8,128], index: 4, kind: output, shape index: {}]  }
   0x1   :  { %v1522_v0 = vld [vmem:[%s2086_s2 + $0x4] ss:$12 sps:$4 sm:$0xff]   ;;  %1209 = vmatprep.subr.bf16.mxu1 %v1491_v1  ;;  %216 = vmatprep.mubr.bf16.mxu0 %v1492_v2  ;;  %v1529_v3 = vld [vmem:[%s2086_s2] ss:$12 sps:$4 sm:$0xff]   ;;  %v1537_v4 = vld [vmem:[%s2086_s2 + $0x1c] ss:$12 sps:$4 sm:$0xff]  }
   0x2   :  { %1225 = vmatprep.mubr.msk.bf16.mxu1 %vm1493_vm0, %v1491_v1  ;;  %184 = vmatprep.subr.bf16.mxu0 %v1522_v0  ;;  %v1543_v5 = vld [vmem:[%s2086_s2 + $0x18] ss:$12 sps:$4 sm:$0xff]   ;;  %v1549_v6 = vld [vmem:[%s2086_s2 + $0x34] ss:$12 sps:$4 sm:$0xff]   ;;  %v1555_v7 = vld [vmem:[%s2086_s2 + $0x30] ss:$12 sps:$4 sm:$0xff]  }
   0x3   :  { %185 = vmatpush1.bf16.msra.mxu0 %v1529_v3  ;;  %v1561_v8 = vld [vmem:[%s2086_s2 + $0x4c] ss:$12 sps:$4 sm:$0xff]   ;;  %v1566_v9 = vld [vmem:[%s2086_s2 + $0x8] ss:$12 sps:$4 sm:$0xff]   ;;  %v1579_v11 = vld [vmem:[%s2086_s2 + $0x64] ss:$12 sps:$4 sm:$0xff]  }
   0x4   :  { %186 = vmatprep.subr.bf16.mxu0 %v1537_v4  ;;  %v1572_v10 = vld [vmem:[%s2086_s2 + $0x48] ss:$12 sps:$4 sm:$0xff]   ;;  %1210 = vmatpush3.bf16.msra.mxu1 %v1566_v9  ;;  %v1585_v12 = vld [vmem:[%s2086_s2 + $0x20] ss:$12 sps:$4 sm:$0xff]   ;;  %v1597_v14 = vld [vmem:[%s2086_s2 + $0x38] ss:$12 sps:$4 sm:$0xff]  }
   0x5   :  { %1211 = vmatprep.subr.bf16.mxu1 %v1491_v1  ;;  %v1590_v13 = vld [vmem:[%s2086_s2 + $0x60] ss:$12 sps:$4 sm:$0xff]   ;;  %v1603_v15 = vld [vmem:[%s2086_s2 + $0x7c] ss:$12 sps:$4 sm:$0xff]   ;;  %v1610_v16 = vld [vmem:[%s2086_s2 + $0x78] ss:$12 sps:$4 sm:$0xff]  }
   0x6   :  { %v1616_v17 = vld [vmem:[%s2086_s2 + $0x50] ss:$12 sps:$4 sm:$0xff]   ;;  %v1622_v18 = vld [vmem:[%s2086_s2 + $0x94] ss:$12 sps:$4 sm:$0xff]   ;;  %v1641_v21 = vld [vmem:[%s2086_s2 + $0xac] ss:$12 sps:$4 sm:$0xff]  }
   0x7   :  { %187 = vmatpush1.bf16.msra.mxu0 %v1543_v5  ;;  %v1629_v19 = vld [vmem:[%s2086_s2 + $0x90] ss:$12 sps:$4 sm:$0xff]   ;;  %v1635_v20 = vld [vmem:[%s2086_s2 + $0x68] ss:$12 sps:$4 sm:$0xff]   ;;  %v1653_v23 = vld [vmem:[%s2087_s1] sm:$0xff] }
   0x8   :  { %188 = vmatprep.subr.bf16.mxu0 %v1549_v6  ;;  %1212 = vmatpush3.bf16.msra.mxu1 %v1585_v12  ;;  %v1648_v22 = vld [vmem:[%s2086_s2 + $0xa8] ss:$12 sps:$4 sm:$0xff]   ;;  %v1659_v24 = vld [vmem:[%s2086_s2 + $0x80] ss:$12 sps:$4 sm:$0xff]   ;;  %v55_v25 = vpack.c.bf16 %v1653_v23, %v1653_v23  ;;  %v1670_v26 = vld [vmem:[%s2086_s2 + $0x98] ss:$12 sps:$4 sm:$0xff]  }
   0x9   :  { %1213 = vmatprep.subr.bf16.mxu1 %v1491_v1  ;;  %v1678_v27 = vld [vmem:[%s2086_s2 + $0xb0] ss:$12 sps:$4 sm:$0xff]   ;;  %v52_v28 = vld [vmem:[%s2088_s0] sm:$0xff]  ;;  %v53_v31 = vld [vmem:[%s2088_s0 + $0x8] sm:$0xff] }
   0xa   :  { %v1727_v45 = vld [vmem:[%s2089_s3] ss:$0 sm:$0xff]  ;;  %v54_v49 = vld [vmem:[%s2088_s0 + $0x10] sm:$0xff]  ;;  %v1095_v59 = vld [vmem:[%s2088_s0 + $0x18] sm:$0xff] }
   0xb   :  { %189 = vmatpush1.bf16.msra.mxu0 %v1555_v7  ;;  %v1096_v63 = vld [vmem:[%s2088_s0 + $0x20] sm:$0xff] }
   0xc   :  { %190 = vmatprep.subr.bf16.mxu0 %v1561_v8  ;;  %1214 = vmatpush3.bf16.msra.mxu1 %v1597_v14 }
   0xd   :  { %1215 = vmatprep.subr.bf16.mxu1 %v1491_v1 }
   0xf   :  { %191 = vmatpush1.bf16.msra.mxu0 %v1572_v10 }
  0x10   :  { %192 = vmatprep.subr.bf16.mxu0 %v1579_v11  ;;  %1216 = vmatpush3.bf16.msra.mxu1 %v1616_v17 }
  0x11   :  { %1217 = vmatprep.subr.bf16.mxu1 %v1491_v1 }
  0x13   :  { %193 = vmatpush1.bf16.msra.mxu0 %v1590_v13 }
  0x14   :  { %194 = vmatprep.subr.bf16.mxu0 %v1603_v15  ;;  %1218 = vmatpush3.bf16.msra.mxu1 %v1635_v20 }
  0x15   :  { %1219 = vmatprep.subr.bf16.mxu1 %v1491_v1 }
  0x17   :  { %195 = vmatpush1.bf16.msra.mxu0 %v1610_v16 }
  0x18   :  { %196 = vmatprep.subr.bf16.mxu0 %v1622_v18  ;;  %1220 = vmatpush3.bf16.msra.mxu1 %v1659_v24 }
  0x19   :  { %1221 = vmatprep.subr.bf16.mxu1 %v1491_v1 }
  0x1b   :  { %197 = vmatpush1.bf16.msra.mxu0 %v1629_v19 }
  0x1c   :  { %198 = vmatprep.subr.bf16.mxu0 %v1641_v21  ;;  %1222 = vmatpush3.bf16.msra.mxu1 %v1670_v26 }
  0x1d   :  { %1223 = vmatprep.subr.bf16.mxu1 %v1491_v1 }
  0x1f   :  { %199 = vmatpush1.bf16.msra.mxu0 %v1648_v22 }
  0x20   :  { %299 = vmatprep.subr.bf16.mxu0 %v1522_v0  ;;  %1224 = vmatpush3.bf16.msra.mxu1 %v1678_v27 }
  0x21   :  { %1229 = vmatprep.subr.bf16.mxu1 %v1491_v1 }
  0x22   :  { %217 = vmatmul.mubr.bf16.vlgmr.msra.gmra.mrb[0].mxu0 %v55_v25 }
  0x23   :  { %300 = vmatpush1.bf16.msra.mxu0 %v1529_v3  ;;  %331 = vmatprep.mubr.bf16.mxu0 %v1492_v2 }
  0x24   :  { %301 = vmatprep.subr.bf16.mxu0 %v1537_v4  ;;  %1226 = vmatmul.mubr.bf16.vlgmr.msra.gmra.mrb[0].mxu1 %v55_v25 }
  0x25   :  { %1230 = vmatpush3.bf16.msra.mxu1 %v1566_v9  ;;  %1245 = vmatprep.mubr.msk.bf16.mxu1 %vm1493_vm0, %v1491_v1 }
  0x26   :  { %1231 = vmatprep.subr.bf16.mxu1 %v1491_v1 }
  0x27   :  { %302 = vmatpush1.bf16.msra.mxu0 %v1543_v5 }
  0x28   :  { %303 = vmatprep.subr.bf16.mxu0 %v1549_v6 }
  0x29   :  { %1232 = vmatpush3.bf16.msra.mxu1 %v1585_v12 }
  0x2a   :  { %1233 = vmatprep.subr.bf16.mxu1 %v1491_v1 }
  0x2b   :  { %304 = vmatpush1.bf16.msra.mxu0 %v1555_v7 }
  0x2c   :  { %305 = vmatprep.subr.bf16.mxu0 %v1561_v8 }
  0x2d   :  { %1234 = vmatpush3.bf16.msra.mxu1 %v1597_v14 }
  0x2e   :  { %1235 = vmatprep.subr.bf16.mxu1 %v1491_v1 }
  0x2f   :  { %306 = vmatpush1.bf16.msra.mxu0 %v1572_v10 }
  0x30   :  { %307 = vmatprep.subr.bf16.mxu0 %v1579_v11 }
  0x31   :  { %1236 = vmatpush3.bf16.msra.mxu1 %v1616_v17 }
  0x32   :  { %1237 = vmatprep.subr.bf16.mxu1 %v1491_v1 }
  0x33   :  { %308 = vmatpush1.bf16.msra.mxu0 %v1590_v13 }
  0x34   :  { %309 = vmatprep.subr.bf16.mxu0 %v1603_v15 }
  0x35   :  { %1238 = vmatpush3.bf16.msra.mxu1 %v1635_v20 }
  0x36   :  { %1239 = vmatprep.subr.bf16.mxu1 %v1491_v1 }
  0x37   :  { %310 = vmatpush1.bf16.msra.mxu0 %v1610_v16 }
  0x38   :  { %311 = vmatprep.subr.bf16.mxu0 %v1622_v18 }
  0x39   :  { %1240 = vmatpush3.bf16.msra.mxu1 %v1659_v24 }
  0x3a   :  { %1241 = vmatprep.subr.bf16.mxu1 %v1491_v1 }
  0x3b   :  { %312 = vmatpush1.bf16.msra.mxu0 %v1629_v19 }
  0x3c   :  { %313 = vmatprep.subr.bf16.mxu0 %v1641_v21 }
  0x3d   :  { %1242 = vmatpush3.bf16.msra.mxu1 %v1670_v26 }
  0x3e   :  { %1243 = vmatprep.subr.bf16.mxu1 %v1491_v1 }
  0x3f   :  { %314 = vmatpush1.bf16.msra.mxu0 %v1648_v22 }
  0x40   :  { %409 = vmatprep.subr.bf16.mxu0 %v1522_v0 }
  0x41   :  { %1244 = vmatpush3.bf16.msra.mxu1 %v1678_v27 }
  0x42   :  { %1249 = vmatprep.subr.bf16.mxu1 %v1491_v1 }
  0xf5   :  { %v218_v29 = vpop.f32.mrb[0].mxu0 }
  0xf6   :  { %v265_v30 = vadd.f32 %v218_v29, %v52_v28  ;;  %v220_v32 = vpop.f32.mrb[1].mxu0 }
  0xf7   :  { %v222_v33 = vpop.f32.mrb[2].mxu0  ;;  %v272_v36 = vadd.f32 %v220_v32, %v53_v31  ;;  %v259_v38 = vpop.f32.mrb[0].mxu1 }
  0xf8   :  { %v1092_v34 = vmul.f32 -1.442695, %v265_v30  ;;  %v223_v35 = vpop.f32.mrb[3].mxu0  ;;  %v1227_v39 = vpop.f32.mrb[1].mxu1  ;;  %v285_v47 = vadd.f32 %v1727_v45, %v259_v38 }
  0xf9   :  { %v1093_v37 = vmul.f32 -1.442695, %v272_v36  ;;  %v262_v40 = vpop.f32.mrb[2].mxu1 }
  0xfa   :  { %1404 = vpow2.f32 %v1092_v34  ;;  %v1228_v41 = vpop.f32.mrb[3].mxu1 }
  0xfb   :  { %1406 = vpow2.f32 %v1093_v37  ;;  %v1097_v41 = vld [vmem:[%s2088_s0 + $0x28] sm:$0xff] }
 0x104   :  { %v1405_v42 = vpop.eup %1404 }
 0x105   :  { %v269_v43 = vadd.f32 1.0, %v1405_v42  ;;  %v1407_v44 = vpop.eup %1406 }
 0x106   :  { %v276_v46 = vadd.f32 1.0, %v1407_v44 }
 0x107   :  { %1408 = vrcp.f32 %v269_v43 }
 0x108   :  { %1410 = vrcp.f32 %v276_v46 }
 0x111   :  { %v1409_v48 = vpop.eup %1408 }
 0x112   :  { %v286_v50 = vmul.f32 %v1409_v48, %v285_v47  ;;  %v1411_v52 = vpop.eup %1410 }
 0x113   :  { %v289_v53 = vsub.f32 1.0, %v1411_v52  ;;  %v291_v56 = vmul.f32 %v1411_v52, %v1653_v23  ;;  %v1101_v52 = vld [vmem:[%s2088_s0 + $0x30] sm:$0xff] }
 0x114   :  { %v287_v51 = vadd.f32 %v286_v50, %v54_v49 }
 0x116   :  { %1412 = vtanh.f32 %v287_v51 }
 0x120   :  { %v1413_v54 = vpop.eup %1412 }
 0x121   :  { %v290_v55 = vmul.f32 %v1413_v54, %v289_v53 }
 0x123   :  { %v1734_v57 = vadd.f32 %v291_v56, %v290_v55  ;;  %v1102_v56 = vld [vmem:[%s2088_s0 + $0x38] sm:$0xff] }
 0x125   :  { %293 = vst [vmem:[%s2090_s4] sm:$0xff] %v1734_v57  ;;  %v298_v58 = vpack.c.bf16 %v1734_v57, %v1734_v57 }
 0x127   :  { %332 = vmatmul.mubr.bf16.vlgmr.msra.gmra.mrb[4].mxu0 %v298_v58  ;;  %1246 = vmatmul.mubr.bf16.vlgmr.msra.gmra.mrb[4].mxu1 %v298_v58 }
 0x128   :  { %410 = vmatpush1.bf16.msra.mxu0 %v1529_v3  ;;  %1250 = vmatpush3.bf16.msra.mxu1 %v1566_v9 }
 0x129   :  { %411 = vmatprep.subr.bf16.mxu0 %v1537_v4  ;;  %1251 = vmatprep.subr.bf16.mxu1 %v1491_v1 }
 0x12a   :  { %441 = vmatprep.mubr.bf16.mxu0 %v1492_v2  ;;  %1265 = vmatprep.mubr.msk.bf16.mxu1 %vm1493_vm0, %v1491_v1 }
 0x12c   :  { %412 = vmatpush1.bf16.msra.mxu0 %v1543_v5  ;;  %1252 = vmatpush3.bf16.msra.mxu1 %v1585_v12 }
 0x12d   :  { %413 = vmatprep.subr.bf16.mxu0 %v1549_v6  ;;  %1253 = vmatprep.subr.bf16.mxu1 %v1491_v1 }
 0x130   :  { %414 = vmatpush1.bf16.msra.mxu0 %v1555_v7  ;;  %1254 = vmatpush3.bf16.msra.mxu1 %v1597_v14 }
 0x131   :  { %415 = vmatprep.subr.bf16.mxu0 %v1561_v8  ;;  %1255 = vmatprep.subr.bf16.mxu1 %v1491_v1 }
 0x134   :  { %416 = vmatpush1.bf16.msra.mxu0 %v1572_v10  ;;  %1256 = vmatpush3.bf16.msra.mxu1 %v1616_v17 }
 0x135   :  { %417 = vmatprep.subr.bf16.mxu0 %v1579_v11  ;;  %1257 = vmatprep.subr.bf16.mxu1 %v1491_v1 }
 0x138   :  { %418 = vmatpush1.bf16.msra.mxu0 %v1590_v13  ;;  %1258 = vmatpush3.bf16.msra.mxu1 %v1635_v20 }
 0x139   :  { %419 = vmatprep.subr.bf16.mxu0 %v1603_v15  ;;  %1259 = vmatprep.subr.bf16.mxu1 %v1491_v1 }
 0x13c   :  { %420 = vmatpush1.bf16.msra.mxu0 %v1610_v16  ;;  %1260 = vmatpush3.bf16.msra.mxu1 %v1659_v24 }
 0x13d   :  { %421 = vmatprep.subr.bf16.mxu0 %v1622_v18  ;;  %1261 = vmatprep.subr.bf16.mxu1 %v1491_v1 }
 0x140   :  { %422 = vmatpush1.bf16.msra.mxu0 %v1629_v19  ;;  %1262 = vmatpush3.bf16.msra.mxu1 %v1670_v26 }
 0x141   :  { %423 = vmatprep.subr.bf16.mxu0 %v1641_v21  ;;  %1263 = vmatprep.subr.bf16.mxu1 %v1491_v1 }
 0x144   :  { %424 = vmatpush1.bf16.msra.mxu0 %v1648_v22  ;;  %1264 = vmatpush3.bf16.msra.mxu1 %v1678_v27 }
 0x145   :  { %519 = vmatprep.subr.bf16.mxu0 %v1522_v0  ;;  %1269 = vmatprep.subr.bf16.mxu1 %v1491_v1 }
 0x1fa   :  { %v333_v60 = vpop.f32.mrb[4].mxu0  ;;  %v374_v61 = vpop.f32.mrb[4].mxu1 }
 0x1fb   :  { %v380_v62 = vadd.f32 %v1095_v59, %v333_v60  ;;  %v335_v23 = vpop.f32.mrb[5].mxu0  ;;  %v1247_v25 = vpop.f32.mrb[5].mxu1  ;;  %v394_v39 = vadd.f32 %v1727_v45, %v374_v61 }
 0x1fc   :  { %v337_v28 = vpop.f32.mrb[6].mxu0  ;;  %v377_v29 = vpop.f32.mrb[6].mxu1  ;;  %v387_v33 = vadd.f32 %v1096_v63, %v335_v23 }
 0x1fd   :  { %v1098_v30 = vmul.f32 -1.442695, %v380_v62  ;;  %v338_v31 = vpop.f32.mrb[7].mxu0  ;;  %v1248_v32 = vpop.f32.mrb[7].mxu1 }
 0x1fe   :  { %v1099_v34 = vmul.f32 -1.442695, %v387_v33 }
 0x1ff   :  { %1414 = vpow2.f32 %v1098_v30 }
 0x200   :  { %1416 = vpow2.f32 %v1099_v34  ;;  %v1103_v34 = vld [vmem:[%s2088_s0 + $0x40] sm:$0xff] }
 0x209   :  { %v1415_v35 = vpop.eup %1414 }
 0x20a   :  { %v384_v36 = vadd.f32 1.0, %v1415_v35  ;;  %v1417_v37 = vpop.eup %1416 }
 0x20b   :  { %v391_v38 = vadd.f32 1.0, %v1417_v37 }
 0x20c   :  { %1418 = vrcp.f32 %v384_v36 }
 0x20d   :  { %1420 = vrcp.f32 %v391_v38 }
 0x216   :  { %v1419_v40 = vpop.eup %1418 }
 0x217   :  { %v395_v42 = vmul.f32 %v1419_v40, %v394_v39  ;;  %v1421_v44 = vpop.eup %1420 }
 0x218   :  { %v398_v46 = vsub.f32 1.0, %v1421_v44  ;;  %v400_v49 = vmul.f32 %v1421_v44, %v1734_v57  ;;  %v1107_v44 = vld [vmem:[%s2088_s0 + $0x48] sm:$0xff] }
 0x219   :  { %v396_v43 = vadd.f32 %v1097_v41, %v395_v42 }
 0x21b   :  { %1422 = vtanh.f32 %v396_v43 }
 0x225   :  { %v1423_v47 = vpop.eup %1422 }
 0x226   :  { %v399_v48 = vmul.f32 %v1423_v47, %v398_v46 }
 0x228   :  { %v1788_v50 = vadd.f32 %v400_v49, %v399_v48  ;;  %v1108_v49 = vld [vmem:[%s2088_s0 + $0x50] sm:$0xff] }
 0x22a   :  { %1100 = vst [vmem:[%s2090_s4 + $0x8] sm:$0xff] %v1788_v50  ;;  %v408_v51 = vpack.c.bf16 %v1788_v50, %v1788_v50 }
 0x22c   :  { %442 = vmatmul.mubr.bf16.vlgmr.msra.gmra.mrb[8].mxu0 %v408_v51  ;;  %1266 = vmatmul.mubr.bf16.vlgmr.msra.gmra.mrb[8].mxu1 %v408_v51 }
 0x22d   :  { %520 = vmatpush1.bf16.msra.mxu0 %v1529_v3  ;;  %1270 = vmatpush3.bf16.msra.mxu1 %v1566_v9 }
 0x22e   :  { %521 = vmatprep.subr.bf16.mxu0 %v1537_v4  ;;  %1271 = vmatprep.subr.bf16.mxu1 %v1491_v1 }
 0x22f   :  { %551 = vmatprep.mubr.bf16.mxu0 %v1492_v2  ;;  %1285 = vmatprep.mubr.msk.bf16.mxu1 %vm1493_vm0, %v1491_v1 }
 0x231   :  { %522 = vmatpush1.bf16.msra.mxu0 %v1543_v5  ;;  %1272 = vmatpush3.bf16.msra.mxu1 %v1585_v12 }
 0x232   :  { %523 = vmatprep.subr.bf16.mxu0 %v1549_v6  ;;  %1273 = vmatprep.subr.bf16.mxu1 %v1491_v1 }
 0x235   :  { %524 = vmatpush1.bf16.msra.mxu0 %v1555_v7  ;;  %1274 = vmatpush3.bf16.msra.mxu1 %v1597_v14 }
 0x236   :  { %525 = vmatprep.subr.bf16.mxu0 %v1561_v8  ;;  %1275 = vmatprep.subr.bf16.mxu1 %v1491_v1 }
 0x239   :  { %526 = vmatpush1.bf16.msra.mxu0 %v1572_v10  ;;  %1276 = vmatpush3.bf16.msra.mxu1 %v1616_v17 }
 0x23a   :  { %527 = vmatprep.subr.bf16.mxu0 %v1579_v11  ;;  %1277 = vmatprep.subr.bf16.mxu1 %v1491_v1 }
 0x23d   :  { %528 = vmatpush1.bf16.msra.mxu0 %v1590_v13  ;;  %1278 = vmatpush3.bf16.msra.mxu1 %v1635_v20 }
 0x23e   :  { %529 = vmatprep.subr.bf16.mxu0 %v1603_v15  ;;  %1279 = vmatprep.subr.bf16.mxu1 %v1491_v1 }
 0x241   :  { %530 = vmatpush1.bf16.msra.mxu0 %v1610_v16  ;;  %1280 = vmatpush3.bf16.msra.mxu1 %v1659_v24 }
 0x242   :  { %531 = vmatprep.subr.bf16.mxu0 %v1622_v18  ;;  %1281 = vmatprep.subr.bf16.mxu1 %v1491_v1 }
 0x245   :  { %532 = vmatpush1.bf16.msra.mxu0 %v1629_v19  ;;  %1282 = vmatpush3.bf16.msra.mxu1 %v1670_v26 }
 0x246   :  { %533 = vmatprep.subr.bf16.mxu0 %v1641_v21  ;;  %1283 = vmatprep.subr.bf16.mxu1 %v1491_v1 }
 0x249   :  { %534 = vmatpush1.bf16.msra.mxu0 %v1648_v22  ;;  %1284 = vmatpush3.bf16.msra.mxu1 %v1678_v27 }
 0x24a   :  { %629 = vmatprep.subr.bf16.mxu0 %v1522_v0  ;;  %1289 = vmatprep.subr.bf16.mxu1 %v1491_v1 }
 0x2ff   :  { %v443_v53 = vpop.f32.mrb[8].mxu0  ;;  %v484_v54 = vpop.f32.mrb[8].mxu1 }
 0x300   :  { %v490_v55 = vadd.f32 %v1101_v52, %v443_v53  ;;  %v445_v57 = vpop.f32.mrb[9].mxu0  ;;  %v1267_v58 = vpop.f32.mrb[9].mxu1  ;;  %v504_v32 = vadd.f32 %v1727_v45, %v484_v54 }
 0x301   :  { %v447_v59 = vpop.f32.mrb[10].mxu0  ;;  %v487_v60 = vpop.f32.mrb[10].mxu1  ;;  %v497_v23 = vadd.f32 %v1102_v56, %v445_v57 }
 0x302   :  { %v1104_v61 = vmul.f32 -1.442695, %v490_v55  ;;  %v448_v62 = vpop.f32.mrb[11].mxu0  ;;  %v1268_v63 = vpop.f32.mrb[11].mxu1 }
 0x303   :  { %v1105_v25 = vmul.f32 -1.442695, %v497_v23 }
 0x304   :  { %1424 = vpow2.f32 %v1104_v61 }
 0x305   :  { %1426 = vpow2.f32 %v1105_v25  ;;  %v1109_v25 = vld [vmem:[%s2088_s0 + $0x58] sm:$0xff] }
 0x30e   :  { %v1425_v28 = vpop.eup %1424 }
 0x30f   :  { %v494_v29 = vadd.f32 1.0, %v1425_v28  ;;  %v1427_v30 = vpop.eup %1426 }
 0x310   :  { %v501_v31 = vadd.f32 1.0, %v1427_v30 }
 0x311   :  { %1428 = vrcp.f32 %v494_v29 }
 0x312   :  { %1430 = vrcp.f32 %v501_v31 }
 0x31b   :  { %v1429_v33 = vpop.eup %1428 }
 0x31c   :  { %v505_v35 = vmul.f32 %v1429_v33, %v504_v32  ;;  %v1431_v37 = vpop.eup %1430 }
 0x31d   :  { %v508_v38 = vsub.f32 1.0, %v1431_v37  ;;  %v510_v41 = vmul.f32 %v1431_v37, %v1788_v50  ;;  %v1113_v37 = vld [vmem:[%s2088_s0 + $0x60] sm:$0xff] }
 0x31e   :  { %v506_v36 = vadd.f32 %v1103_v34, %v505_v35 }
 0x320   :  { %1432 = vtanh.f32 %v506_v36 }
 0x32a   :  { %v1433_v39 = vpop.eup %1432 }
 0x32b   :  { %v509_v40 = vmul.f32 %v1433_v39, %v508_v38 }
 0x32d   :  { %v1842_v42 = vadd.f32 %v510_v41, %v509_v40  ;;  %v1114_v41 = vld [vmem:[%s2088_s0 + $0x68] sm:$0xff] }
 0x32f   :  { %1106 = vst [vmem:[%s2090_s4 + $0x10] sm:$0xff] %v1842_v42  ;;  %v518_v43 = vpack.c.bf16 %v1842_v42, %v1842_v42 }
 0x331   :  { %552 = vmatmul.mubr.bf16.vlgmr.msra.gmra.mrb[12].mxu0 %v518_v43  ;;  %1286 = vmatmul.mubr.bf16.vlgmr.msra.gmra.mrb[12].mxu1 %v518_v43 }
 0x332   :  { %630 = vmatpush1.bf16.msra.mxu0 %v1529_v3  ;;  %1290 = vmatpush3.bf16.msra.mxu1 %v1566_v9 }
 0x333   :  { %631 = vmatprep.subr.bf16.mxu0 %v1537_v4  ;;  %1291 = vmatprep.subr.bf16.mxu1 %v1491_v1 }
 0x334   :  { %661 = vmatprep.mubr.bf16.mxu0 %v1492_v2  ;;  %1305 = vmatprep.mubr.msk.bf16.mxu1 %vm1493_vm0, %v1491_v1 }
 0x336   :  { %632 = vmatpush1.bf16.msra.mxu0 %v1543_v5  ;;  %1292 = vmatpush3.bf16.msra.mxu1 %v1585_v12 }
 0x337   :  { %633 = vmatprep.subr.bf16.mxu0 %v1549_v6  ;;  %1293 = vmatprep.subr.bf16.mxu1 %v1491_v1 }
 0x33a   :  { %634 = vmatpush1.bf16.msra.mxu0 %v1555_v7  ;;  %1294 = vmatpush3.bf16.msra.mxu1 %v1597_v14 }
 0x33b   :  { %635 = vmatprep.subr.bf16.mxu0 %v1561_v8  ;;  %1295 = vmatprep.subr.bf16.mxu1 %v1491_v1 }
 0x33e   :  { %636 = vmatpush1.bf16.msra.mxu0 %v1572_v10  ;;  %1296 = vmatpush3.bf16.msra.mxu1 %v1616_v17 }
 0x33f   :  { %637 = vmatprep.subr.bf16.mxu0 %v1579_v11  ;;  %1297 = vmatprep.subr.bf16.mxu1 %v1491_v1 }
 0x342   :  { %638 = vmatpush1.bf16.msra.mxu0 %v1590_v13  ;;  %1298 = vmatpush3.bf16.msra.mxu1 %v1635_v20 }
 0x343   :  { %639 = vmatprep.subr.bf16.mxu0 %v1603_v15  ;;  %1299 = vmatprep.subr.bf16.mxu1 %v1491_v1 }
 0x346   :  { %640 = vmatpush1.bf16.msra.mxu0 %v1610_v16  ;;  %1300 = vmatpush3.bf16.msra.mxu1 %v1659_v24 }
 0x347   :  { %641 = vmatprep.subr.bf16.mxu0 %v1622_v18  ;;  %1301 = vmatprep.subr.bf16.mxu1 %v1491_v1 }
 0x34a   :  { %642 = vmatpush1.bf16.msra.mxu0 %v1629_v19  ;;  %1302 = vmatpush3.bf16.msra.mxu1 %v1670_v26 }
 0x34b   :  { %643 = vmatprep.subr.bf16.mxu0 %v1641_v21  ;;  %1303 = vmatprep.subr.bf16.mxu1 %v1491_v1 }
 0x34e   :  { %644 = vmatpush1.bf16.msra.mxu0 %v1648_v22  ;;  %1304 = vmatpush3.bf16.msra.mxu1 %v1678_v27 }
 0x34f   :  { %739 = vmatprep.subr.bf16.mxu0 %v1522_v0  ;;  %1309 = vmatprep.subr.bf16.mxu1 %v1491_v1 }
 0x404   :  { %v553_v46 = vpop.f32.mrb[12].mxu0  ;;  %v594_v47 = vpop.f32.mrb[12].mxu1 }
 0x405   :  { %v600_v48 = vadd.f32 %v1107_v44, %v553_v46  ;;  %v555_v50 = vpop.f32.mrb[13].mxu0  ;;  %v1287_v51 = vpop.f32.mrb[13].mxu1  ;;  %v614_v63 = vadd.f32 %v1727_v45, %v594_v47 }
 0x406   :  { %v557_v52 = vpop.f32.mrb[14].mxu0  ;;  %v597_v53 = vpop.f32.mrb[14].mxu1  ;;  %v607_v57 = vadd.f32 %v1108_v49, %v555_v50 }
 0x407   :  { %v1110_v54 = vmul.f32 -1.442695, %v600_v48  ;;  %v558_v55 = vpop.f32.mrb[15].mxu0  ;;  %v1288_v56 = vpop.f32.mrb[15].mxu1 }
 0x408   :  { %v1111_v58 = vmul.f32 -1.442695, %v607_v57 }
 0x409   :  { %1434 = vpow2.f32 %v1110_v54 }
 0x40a   :  { %1436 = vpow2.f32 %v1111_v58  ;;  %v1115_v58 = vld [vmem:[%s2088_s0 + $0x70] sm:$0xff] }
 0x413   :  { %v1435_v59 = vpop.eup %1434 }
 0x414   :  { %v604_v60 = vadd.f32 1.0, %v1435_v59  ;;  %v1437_v61 = vpop.eup %1436 }
 0x415   :  { %v611_v62 = vadd.f32 1.0, %v1437_v61 }
 0x416   :  { %1438 = vrcp.f32 %v604_v60 }
 0x417   :  { %1440 = vrcp.f32 %v611_v62 }
 0x420   :  { %v1439_v23 = vpop.eup %1438 }
 0x421   :  { %v615_v28 = vmul.f32 %v1439_v23, %v614_v63  ;;  %v1441_v30 = vpop.eup %1440 }
 0x422   :  { %v618_v31 = vsub.f32 1.0, %v1441_v30  ;;  %v620_v34 = vmul.f32 %v1441_v30, %v1842_v42 }
 0x423   :  { %v616_v29 = vadd.f32 %v1109_v25, %v615_v28 }
 0x425   :  { %1442 = vtanh.f32 %v616_v29 }
 0x42f   :  { %v1443_v32 = vpop.eup %1442 }
 0x430   :  { %v619_v33 = vmul.f32 %v1443_v32, %v618_v31 }
 0x432   :  { %v1896_v35 = vadd.f32 %v620_v34, %v619_v33 }
 0x434   :  { %1112 = vst [vmem:[%s2090_s4 + $0x18] sm:$0xff] %v1896_v35  ;;  %v628_v36 = vpack.c.bf16 %v1896_v35, %v1896_v35 }
 0x436   :  { %662 = vmatmul.mubr.bf16.vlgmr.msra.gmra.mrb[16].mxu0 %v628_v36  ;;  %1306 = vmatmul.mubr.bf16.vlgmr.msra.gmra.mrb[16].mxu1 %v628_v36 }
 0x437   :  { %740 = vmatpush1.bf16.msra.mxu0 %v1529_v3  ;;  %1310 = vmatpush3.bf16.msra.mxu1 %v1566_v9 }
 0x438   :  { %741 = vmatprep.subr.bf16.mxu0 %v1537_v4  ;;  %1311 = vmatprep.subr.bf16.mxu1 %v1491_v1 }
 0x439   :  { %771 = vmatprep.mubr.bf16.mxu0 %v1492_v2  ;;  %1325 = vmatprep.mubr.msk.bf16.mxu1 %vm1493_vm0, %v1491_v1 }
 0x43b   :  { %742 = vmatpush1.bf16.msra.mxu0 %v1543_v5  ;;  %1312 = vmatpush3.bf16.msra.mxu1 %v1585_v12 }
 0x43c   :  { %743 = vmatprep.subr.bf16.mxu0 %v1549_v6  ;;  %1313 = vmatprep.subr.bf16.mxu1 %v1491_v1 }
 0x43f   :  { %744 = vmatpush1.bf16.msra.mxu0 %v1555_v7  ;;  %1314 = vmatpush3.bf16.msra.mxu1 %v1597_v14 }
 0x440   :  { %745 = vmatprep.subr.bf16.mxu0 %v1561_v8  ;;  %1315 = vmatprep.subr.bf16.mxu1 %v1491_v1 }
 0x443   :  { %746 = vmatpush1.bf16.msra.mxu0 %v1572_v10  ;;  %1316 = vmatpush3.bf16.msra.mxu1 %v1616_v17 }
 0x444   :  { %747 = vmatprep.subr.bf16.mxu0 %v1579_v11  ;;  %1317 = vmatprep.subr.bf16.mxu1 %v1491_v1 }
 0x447   :  { %748 = vmatpush1.bf16.msra.mxu0 %v1590_v13  ;;  %1318 = vmatpush3.bf16.msra.mxu1 %v1635_v20 }
 0x448   :  { %749 = vmatprep.subr.bf16.mxu0 %v1603_v15  ;;  %1319 = vmatprep.subr.bf16.mxu1 %v1491_v1 }
 0x44b   :  { %750 = vmatpush1.bf16.msra.mxu0 %v1610_v16  ;;  %1320 = vmatpush3.bf16.msra.mxu1 %v1659_v24 }
 0x44c   :  { %751 = vmatprep.subr.bf16.mxu0 %v1622_v18  ;;  %1321 = vmatprep.subr.bf16.mxu1 %v1491_v1 }
 0x44f   :  { %752 = vmatpush1.bf16.msra.mxu0 %v1629_v19  ;;  %1322 = vmatpush3.bf16.msra.mxu1 %v1670_v26 }
 0x450   :  { %753 = vmatprep.subr.bf16.mxu0 %v1641_v21  ;;  %1323 = vmatprep.subr.bf16.mxu1 %v1491_v1 }
 0x453   :  { %754 = vmatpush1.bf16.msra.mxu0 %v1648_v22  ;;  %1324 = vmatpush3.bf16.msra.mxu1 %v1678_v27 }
 0x454   :  { %849 = vmatprep.subr.bf16.mxu0 %v1522_v0  ;;  %1329 = vmatprep.subr.bf16.mxu1 %v1491_v1 }
 0x509   :  { %v663_v38 = vpop.f32.mrb[16].mxu0  ;;  %v704_v39 = vpop.f32.mrb[16].mxu1 }
 0x50a   :  { %v710_v40 = vadd.f32 %v1113_v37, %v663_v38  ;;  %v665_v42 = vpop.f32.mrb[17].mxu0  ;;  %v1307_v43 = vpop.f32.mrb[17].mxu1  ;;  %v724_v56 = vadd.f32 %v1727_v45, %v704_v39 }
 0x50b   :  { %v667_v44 = vpop.f32.mrb[18].mxu0  ;;  %v707_v46 = vpop.f32.mrb[18].mxu1  ;;  %v717_v50 = vadd.f32 %v1114_v41, %v665_v42  ;;  %v1121_v42 = vld [vmem:[%s2088_s0 + $0x88] sm:$0xff] }
 0x50c   :  { %v1116_v47 = vmul.f32 -1.442695, %v710_v40  ;;  %v668_v48 = vpop.f32.mrb[19].mxu0  ;;  %v1308_v49 = vpop.f32.mrb[19].mxu1 }
 0x50d   :  { %v1117_v51 = vmul.f32 -1.442695, %v717_v50 }
 0x50e   :  { %1444 = vpow2.f32 %v1116_v47 }
 0x50f   :  { %1446 = vpow2.f32 %v1117_v51 }
 0x518   :  { %v1445_v52 = vpop.eup %1444 }
 0x519   :  { %v714_v53 = vadd.f32 1.0, %v1445_v52  ;;  %v1447_v54 = vpop.eup %1446 }
 0x51a   :  { %v721_v55 = vadd.f32 1.0, %v1447_v54  ;;  %v1485_v54 = vld [vmem:[%s2086_s2 + $0x1c] ss:$12 sps:$4 sm:$0xff]  }
 0x51b   :  { %1448 = vrcp.f32 %v714_v53  ;;  %v1484_v53 = vld [vmem:[%s2086_s2] ss:$12 sps:$4 sm:$0xff]  }
 0x51c   :  { %1450 = vrcp.f32 %v721_v55  ;;  %v1486_v55 = vld [vmem:[%s2086_s2 + $0x18] ss:$12 sps:$4 sm:$0xff]  }
 0x525   :  { %v1449_v57 = vpop.eup %1448 }
 0x526   :  { %v725_v59 = vmul.f32 %v1449_v57, %v724_v56  ;;  %v1451_v61 = vpop.eup %1450  ;;  %v1489_v56 = vld [vmem:[%s2086_s2 + $0x4c] ss:$12 sps:$4 sm:$0xff]  }
 0x527   :  { %v728_v62 = vsub.f32 1.0, %v1451_v61  ;;  %v730_v25 = vmul.f32 %v1451_v61, %v1896_v35 }
 0x528   :  { %v726_v60 = vadd.f32 %v1115_v58, %v725_v59 }
 0x52a   :  { %1452 = vtanh.f32 %v726_v60 }
 0x534   :  { %v1453_v63 = vpop.eup %1452 }
 0x535   :  { %v729_v23 = vmul.f32 %v1453_v63, %v728_v62  ;;  %v1127_v62 = vld [vmem:[%s2088_s0 + $0xa0] sm:$0xff] }
 0x537   :  { %v1950_v28 = vadd.f32 %v730_v25, %v729_v23 }
 0x539   :  { %1118 = vst [vmem:[%s2090_s4 + $0x20] sm:$0xff] %v1950_v28  ;;  %v738_v29 = vpack.c.bf16 %v1950_v28, %v1950_v28 }
 0x53b   :  { %772 = vmatmul.mubr.bf16.vlgmr.msra.gmra.mrb[20].mxu0 %v738_v29  ;;  %1326 = vmatmul.mubr.bf16.vlgmr.msra.gmra.mrb[20].mxu1 %v738_v29 }
 0x53c   :  { %850 = vmatpush1.bf16.msra.mxu0 %v1529_v3  ;;  %1330 = vmatpush3.bf16.msra.mxu1 %v1566_v9  ;;  %v1119_v3 = vld [vmem:[%s2088_s0 + $0x78] sm:$0xff] }
 0x53d   :  { %851 = vmatprep.subr.bf16.mxu0 %v1537_v4  ;;  %1331 = vmatprep.subr.bf16.mxu1 %v1491_v1 }
 0x53e   :  { %881 = vmatprep.mubr.bf16.mxu0 %v1492_v2  ;;  %1345 = vmatprep.mubr.msk.bf16.mxu1 %vm1493_vm0, %v1491_v1 }
 0x540   :  { %852 = vmatpush1.bf16.msra.mxu0 %v1543_v5  ;;  %1332 = vmatpush3.bf16.msra.mxu1 %v1585_v12 }
 0x541   :  { %853 = vmatprep.subr.bf16.mxu0 %v1549_v6  ;;  %1333 = vmatprep.subr.bf16.mxu1 %v1491_v1 }
 0x544   :  { %854 = vmatpush1.bf16.msra.mxu0 %v1555_v7  ;;  %1334 = vmatpush3.bf16.msra.mxu1 %v1597_v14  ;;  %v1120_v7 = vld [vmem:[%s2088_s0 + $0x80] sm:$0xff] }
 0x545   :  { %855 = vmatprep.subr.bf16.mxu0 %v1561_v8  ;;  %1335 = vmatprep.subr.bf16.mxu1 %v1491_v1 }
 0x548   :  { %856 = vmatpush1.bf16.msra.mxu0 %v1572_v10  ;;  %1336 = vmatpush3.bf16.msra.mxu1 %v1616_v17 }
 0x549   :  { %857 = vmatprep.subr.bf16.mxu0 %v1579_v11  ;;  %1337 = vmatprep.subr.bf16.mxu1 %v1491_v1 }
 0x54c   :  { %858 = vmatpush1.bf16.msra.mxu0 %v1590_v13  ;;  %1338 = vmatpush3.bf16.msra.mxu1 %v1635_v20 }
 0x54d   :  { %859 = vmatprep.subr.bf16.mxu0 %v1603_v15  ;;  %1339 = vmatprep.subr.bf16.mxu1 %v1491_v1 }
 0x550   :  { %860 = vmatpush1.bf16.msra.mxu0 %v1610_v16  ;;  %1340 = vmatpush3.bf16.msra.mxu1 %v1659_v24 }
 0x551   :  { %861 = vmatprep.subr.bf16.mxu0 %v1622_v18  ;;  %1341 = vmatprep.subr.bf16.mxu1 %v1491_v1 }
 0x554   :  { %862 = vmatpush1.bf16.msra.mxu0 %v1629_v19  ;;  %1342 = vmatpush3.bf16.msra.mxu1 %v1670_v26 }
 0x555   :  { %863 = vmatprep.subr.bf16.mxu0 %v1641_v21  ;;  %1343 = vmatprep.subr.bf16.mxu1 %v1491_v1 }
 0x558   :  { %864 = vmatpush1.bf16.msra.mxu0 %v1648_v22  ;;  %1344 = vmatpush3.bf16.msra.mxu1 %v1678_v27 }
 0x559   :  { %959 = vmatprep.subr.bf16.mxu0 %v1522_v0  ;;  %1349 = vmatprep.subr.bf16.mxu1 %v1491_v1 }
 0x60e   :  { %v773_v4 = vpop.f32.mrb[20].mxu0  ;;  %v814_v5 = vpop.f32.mrb[20].mxu1 }
 0x60f   :  { %v820_v6 = vadd.f32 %v1119_v3, %v773_v4  ;;  %v775_v8 = vpop.f32.mrb[21].mxu0  ;;  %v1327_v10 = vpop.f32.mrb[21].mxu1  ;;  %v834_v40 = vadd.f32 %v1727_v45, %v814_v5 }
 0x610   :  { %v777_v30 = vpop.f32.mrb[22].mxu0  ;;  %v817_v31 = vpop.f32.mrb[22].mxu1  ;;  %v827_v34 = vadd.f32 %v1120_v7, %v775_v8  ;;  %v1131_v7 = vld [vmem:[%s2088_s0 + $0xa8] sm:$0xff] }
 0x611   :  { %v1122_v32 = vmul.f32 -1.442695, %v820_v6  ;;  %v778_v33 = vpop.f32.mrb[23].mxu0  ;;  %v1328_v0 = vpop.f32.mrb[23].mxu1  ;;  %v1132_v31 = vld [vmem:[%s2088_s0 + $0xb0] sm:$0xff] }
 0x612   :  { %v1123_v35 = vmul.f32 -1.442695, %v827_v34 }
 0x613   :  { %1454 = vpow2.f32 %v1122_v32 }
 0x614   :  { %1456 = vpow2.f32 %v1123_v35 }
 0x61d   :  { %v1455_v36 = vpop.eup %1454 }
 0x61e   :  { %v824_v37 = vadd.f32 1.0, %v1455_v36  ;;  %v1457_v38 = vpop.eup %1456 }
 0x61f   :  { %v831_v39 = vadd.f32 1.0, %v1457_v38 }
 0x620   :  { %1458 = vrcp.f32 %v824_v37 }
 0x621   :  { %1460 = vrcp.f32 %v831_v39 }
 0x62a   :  { %v1459_v41 = vpop.eup %1458 }
 0x62b   :  { %v835_v43 = vmul.f32 %v1459_v41, %v834_v40  ;;  %v1461_v46 = vpop.eup %1460 }
 0x62c   :  { %v838_v47 = vsub.f32 1.0, %v1461_v46  ;;  %v840_v50 = vmul.f32 %v1461_v46, %v1950_v28 }
 0x62d   :  { %v836_v44 = vadd.f32 %v1121_v42, %v835_v43 }
 0x62f   :  { %1462 = vtanh.f32 %v836_v44 }
 0x639   :  { %v1463_v48 = vpop.eup %1462 }
 0x63a   :  { %v839_v49 = vmul.f32 %v1463_v48, %v838_v47  ;;  %v1133_v47 = vld [vmem:[%s2088_s0 + $0xb8] sm:$0xff] }
 0x63c   :  { %v2004_v51 = vadd.f32 %v840_v50, %v839_v49 }
 0x63e   :  { %1124 = vst [vmem:[%s2090_s4 + $0x28] sm:$0xff] %v2004_v51  ;;  %v848_v52 = vpack.c.bf16 %v2004_v51, %v2004_v51 }
 0x640   :  { %882 = vmatmul.mubr.bf16.vlgmr.msra.gmra.mrb[24].mxu0 %v848_v52  ;;  %1346 = vmatmul.mubr.bf16.vlgmr.msra.gmra.mrb[24].mxu1 %v848_v52 }
 0x641   :  { %960 = vmatpush1.bf16.msra.mxu0 %v1484_v53  ;;  %1350 = vmatpush3.bf16.msra.mxu1 %v1566_v9  ;;  %v1487_v9 = vld [vmem:[%s2086_s2 + $0x34] ss:$12 sps:$4 sm:$0xff]  }
 0x642   :  { %961 = vmatprep.subr.bf16.mxu0 %v1485_v54  ;;  %1351 = vmatprep.subr.bf16.mxu1 %v1491_v1 }
 0x643   :  { %991 = vmatprep.mubr.bf16.mxu0 %v1492_v2  ;;  %1365 = vmatprep.mubr.msk.bf16.mxu1 %vm1493_vm0, %v1491_v1  ;;  %v1488_v2 = vld [vmem:[%s2086_s2 + $0x30] ss:$12 sps:$4 sm:$0xff]  }
 0x645   :  { %962 = vmatpush1.bf16.msra.mxu0 %v1486_v55  ;;  %1352 = vmatpush3.bf16.msra.mxu1 %v1585_v12  ;;  %v1490_v12 = vld [vmem:[%s2086_s2 + $0x48] ss:$12 sps:$4 sm:$0xff]  }
 0x646   :  { %963 = vmatprep.subr.bf16.mxu0 %v1487_v9  ;;  %1353 = vmatprep.subr.bf16.mxu1 %v1491_v1 }
 0x649   :  { %964 = vmatpush1.bf16.msra.mxu0 %v1488_v2  ;;  %1354 = vmatpush3.bf16.msra.mxu1 %v1597_v14 }
 0x64a   :  { %965 = vmatprep.subr.bf16.mxu0 %v1489_v56  ;;  %1355 = vmatprep.subr.bf16.mxu1 %v1491_v1 }
 0x64d   :  { %966 = vmatpush1.bf16.msra.mxu0 %v1490_v12  ;;  %1356 = vmatpush3.bf16.msra.mxu1 %v1616_v17 }
 0x64e   :  { %967 = vmatprep.subr.bf16.mxu0 %v1579_v11  ;;  %1357 = vmatprep.subr.bf16.mxu1 %v1491_v1  ;;  %v1125_v11 = vld [vmem:[%s2088_s0 + $0x90] sm:$0xff] }
 0x651   :  { %968 = vmatpush1.bf16.msra.mxu0 %v1590_v13  ;;  %1358 = vmatpush3.bf16.msra.mxu1 %v1635_v20 }
 0x652   :  { %969 = vmatprep.subr.bf16.mxu0 %v1603_v15  ;;  %1359 = vmatprep.subr.bf16.mxu1 %v1491_v1 }
 0x655   :  { %970 = vmatpush1.bf16.msra.mxu0 %v1610_v16  ;;  %1360 = vmatpush3.bf16.msra.mxu1 %v1659_v24  ;;  %v1126_v16 = vld [vmem:[%s2088_s0 + $0x98] sm:$0xff] }
 0x656   :  { %971 = vmatprep.subr.bf16.mxu0 %v1622_v18  ;;  %1361 = vmatprep.subr.bf16.mxu1 %v1491_v1 }
 0x659   :  { %972 = vmatpush1.bf16.msra.mxu0 %v1629_v19  ;;  %1362 = vmatpush3.bf16.msra.mxu1 %v1670_v26 }
 0x65a   :  { %973 = vmatprep.subr.bf16.mxu0 %v1641_v21  ;;  %1363 = vmatprep.subr.bf16.mxu1 %v1491_v1 }
 0x65d   :  { %974 = vmatpush1.bf16.msra.mxu0 %v1648_v22  ;;  %1364 = vmatpush3.bf16.msra.mxu1 %v1678_v27 }
 0x713   :  { %v883_v13 = vpop.f32.mrb[24].mxu0  ;;  %v924_v14 = vpop.f32.mrb[24].mxu1 }
 0x714   :  { %v930_v15 = vadd.f32 %v1125_v11, %v883_v13  ;;  %v885_v17 = vpop.f32.mrb[25].mxu0  ;;  %v1347_v18 = vpop.f32.mrb[25].mxu1  ;;  %v944_v60 = vadd.f32 %v1727_v45, %v924_v14 }
 0x715   :  { %v887_v19 = vpop.f32.mrb[26].mxu0  ;;  %v927_v20 = vpop.f32.mrb[26].mxu1  ;;  %v937_v24 = vadd.f32 %v1126_v16, %v885_v17 }
 0x716   :  { %v1128_v1 = vmul.f32 -1.442695, %v930_v15  ;;  %v888_v21 = vpop.f32.mrb[27].mxu0  ;;  %v1348_v22 = vpop.f32.mrb[27].mxu1 }
 0x717   :  { %v1129_v26 = vmul.f32 -1.442695, %v937_v24 }
 0x718   :  { %1464 = vpow2.f32 %v1128_v1 }
 0x719   :  { %1466 = vpow2.f32 %v1129_v26 }
 0x722   :  { %v1465_v27 = vpop.eup %1464 }
 0x723   :  { %v934_v57 = vadd.f32 1.0, %v1465_v27  ;;  %v1467_v58 = vpop.eup %1466 }
 0x724   :  { %v941_v59 = vadd.f32 1.0, %v1467_v58 }
 0x725   :  { %1468 = vrcp.f32 %v934_v57 }
 0x726   :  { %1470 = vrcp.f32 %v941_v59 }
 0x72f   :  { %v1469_v61 = vpop.eup %1468 }
 0x730   :  { %v945_v63 = vmul.f32 %v1469_v61, %v944_v60  ;;  %v1471_v25 = vpop.eup %1470 }
 0x731   :  { %v948_v28 = vsub.f32 1.0, %v1471_v25  ;;  %v950_v4 = vmul.f32 %v1471_v25, %v2004_v51 }
 0x732   :  { %v946_v23 = vadd.f32 %v1127_v62, %v945_v63 }
 0x734   :  { %1472 = vtanh.f32 %v946_v23 }
 0x73e   :  { %v1473_v29 = vpop.eup %1472 }
 0x73f   :  { %v949_v3 = vmul.f32 %v1473_v29, %v948_v28 }
 0x741   :  { %v951_v5 = vadd.f32 %v950_v4, %v949_v3 }
 0x743   :  { %1130 = vst [vmem:[%s2090_s4 + $0x30] sm:$0xff] %v951_v5  ;;  %v958_v6 = vpack.c.bf16 %v951_v5, %v951_v5 }
 0x745   :  { %992 = vmatmul.mubr.bf16.vlgmr.msra.gmra.mrb[28].mxu0 %v958_v6  ;;  %1366 = vmatmul.mubr.bf16.vlgmr.msra.gmra.mrb[28].mxu1 %v958_v6 }
 0x818   :  { %v993_v8 = vpop.f32.mrb[28].mxu0  ;;  %v1034_v10 = vpop.f32.mrb[28].mxu1 }
 0x819   :  { %v1040_v30 = vadd.f32 %v1131_v7, %v993_v8  ;;  %v995_v32 = vpop.f32.mrb[29].mxu0  ;;  %v1367_v33 = vpop.f32.mrb[29].mxu1  ;;  %v1054_v44 = vadd.f32 %v1727_v45, %v1034_v10 }
 0x81a   :  { %v997_v0 = vpop.f32.mrb[30].mxu0  ;;  %v1037_v34 = vpop.f32.mrb[30].mxu1  ;;  %v1047_v38 = vadd.f32 %v1132_v31, %v995_v32 }
 0x81b   :  { %v1134_v35 = vmul.f32 -1.442695, %v1040_v30  ;;  %v998_v36 = vpop.f32.mrb[31].mxu0  ;;  %v1368_v37 = vpop.f32.mrb[31].mxu1 }
 0x81c   :  { %v1135_v39 = vmul.f32 -1.442695, %v1047_v38 }
 0x81d   :  { %1474 = vpow2.f32 %v1134_v35 }
 0x81e   :  { %1476 = vpow2.f32 %v1135_v39 }
 0x827   :  { %v1475_v40 = vpop.eup %1474 }
 0x828   :  { %v1044_v41 = vadd.f32 1.0, %v1475_v40  ;;  %v1477_v42 = vpop.eup %1476 }
 0x829   :  { %v1051_v43 = vadd.f32 1.0, %v1477_v42 }
 0x82a   :  { %1478 = vrcp.f32 %v1044_v41 }
 0x82b   :  { %1480 = vrcp.f32 %v1051_v43 }
 0x834   :  { %v1479_v46 = vpop.eup %1478 }
 0x835   :  { %v1055_v48 = vmul.f32 %v1479_v46, %v1054_v44  ;;  %v1481_v50 = vpop.eup %1480 }
 0x836   :  { %v1058_v51 = vsub.f32 1.0, %v1481_v50  ;;  %v1060_v54 = vmul.f32 %v1481_v50, %v951_v5 }
 0x837   :  { %v1056_v49 = vadd.f32 %v1133_v47, %v1055_v48 }
 0x839   :  { %1482 = vtanh.f32 %v1056_v49 }
 0x843   :  { %v1483_v52 = vpop.eup %1482 }
 0x844   :  { %v1059_v53 = vmul.f32 %v1483_v52, %v1058_v51 }
 0x846   :  { %v1061_v55 = vadd.f32 %v1060_v54, %v1059_v53 }
 0x848   :  { %1136 = vst [vmem:[%s2090_s4 + $0x38] sm:$0xff] %v1061_v55 }

</bundles_post_ra>
